<compile_context>
chip_gen: v6e
topology: v6e:2x2x1
jax: 0.10.0
libtpu: 0.0.40
codegen_flags: <defaults>
</compile_context>

<pallas_src>
import jax
import jax.numpy as jnp
import numpy as np
from jax import lax
from jax.experimental import pallas as pl
from jax.experimental.pallas import tpu as pltpu

# Hyperparameters from the PyTorch module
IN_CHANNELS = 32
OUT_CHANNELS = 64
KERNEL_SIZE = 4
STRIDE = 2
PADDING = 1
OUTPUT_PADDING = 1
ADD_VALUE = 0.5
SCALE = 2.0


def _fused_gemm_act_kernel(a_ref, b_ref, bias_ref, o_ref):
    # y = A_tile @ B + bias  — this GEMM *is* the transposed convolution, with
    # the 4 output-parity classes packed into the 256 lane-dense output columns.
    y = jnp.dot(a_ref[...], b_ref[...], preferred_element_type=jnp.float32)
    y = y + bias_ref[...]
    # mish(y) = y * tanh(softplus(y)) = y * s / (s + 2),  s = t*(t+2), t = exp(y)
    # single EUP transcendental; clamp exp arg (for y > 20 the factor is 1 in f32)
    t = jnp.exp(jnp.minimum(y, 20.0))
    s = t * (t + 2.0)
    z = y * (s / (s + 2.0))
    z = jnp.clip(z + ADD_VALUE, -1.0, 1.0)          # + add_value, hardtanh[-1, 1]
    o_ref[...] = (z * SCALE).astype(o_ref.dtype)    # * scale


def _pick_row_tile(m):
    """Large sublane-aligned row tile (<=1024), but keep >=2 grid steps (v7x 2 TCs)."""
    max_tile = 1024
    steps = max(2, -(-m // max_tile))
    tm = -(-m // steps)
    tm = -(-tm // 8) * 8
    return max(8, min(tm, max_tile))


def model_forward(x_nchw, w_t, bias):
    """x_nchw: (N, Cin, H, W); w_t: (Cin, Cout, K, K) [PyTorch ConvTranspose2d layout]."""
    N, Cin, H, W = x_nchw.shape
    Cout = w_t.shape[1]
    assert (KERNEL_SIZE, STRIDE, PADDING, OUTPUT_PADDING) == (4, 2, 1, 1)
    OH, OW = 2 * H + 1, 2 * W + 1
    Hp, Wp = H + 1, W + 1            # one 2x2-tap patch per patch-grid position

    # ---- A: 2x2 patches of the spatially pad-1 NHWC input (no dilation zeros) ----
    x_nhwc = jnp.transpose(x_nchw, (0, 2, 3, 1)).astype(jnp.float32)
    x_pad = jnp.pad(x_nhwc, ((0, 0), (1, 1), (1, 1), (0, 0)))
    patches = [x_pad[:, dh:dh + Hp, dw:dw + Wp, :]
               for dh in range(2) for dw in range(2)]
    A = jnp.concatenate(patches, axis=-1).reshape(N * Hp * Wp, 4 * Cin)

    # ---- B: rows (dh, dw, ci) -> cols (qh, qw, co) --------------------------------
    # Patch (i, j), parity class (qh, qw) produces output pixel (2i + qh - 1,
    # 2j + qw - 1); the tap (dh, dw) uses kernel index kh = 2 + qh - 2*dh (same kw).
    w_f = w_t.astype(jnp.float32)
    tap_blocks = []
    for dh in range(2):
        for dw in range(2):
            cols = []
            for qh in range(2):
                for qw in range(2):
                    kh = 2 + qh - 2 * dh
                    kw = 2 + qw - 2 * dw
                    cols.append(w_f[:, :, kh, kw])             # (Cin, Cout)
            tap_blocks.append(jnp.concatenate(cols, axis=1))    # (Cin, 4*Cout)
    B = jnp.concatenate(tap_blocks, axis=0)                     # (4*Cin, 4*Cout)
    bias_row = jnp.tile(bias.astype(jnp.float32), 4).reshape(1, 4 * Cout)

    # ---- fused GEMM + epilogue -----------------------------------------------------
    M, K = A.shape
    NC = 4 * Cout                      # 256: lane-dense output
    TM = _pick_row_tile(M)
    M_pad = -(-M // TM) * TM
    A = jnp.pad(A, ((0, M_pad - M), (0, 0)))

    Y = pl.pallas_call(
        _fused_gemm_act_kernel,
        out_shape=jax.ShapeDtypeStruct((M_pad, NC), jnp.float32),
        grid_spec=pltpu.PrefetchScalarGridSpec(
            num_scalar_prefetch=0,
            grid=(M_pad // TM,),
            in_specs=[
                pl.BlockSpec((TM, K), lambda i: (i, 0)),
                pl.BlockSpec((K, NC), lambda i: (0, 0)),   # resident: constant index
                pl.BlockSpec((1, NC), lambda i: (0, 0)),
            ],
            out_specs=pl.BlockSpec((TM, NC), lambda i: (i, 0)),
        ),
        compiler_params=pltpu.CompilerParams(
            dimension_semantics=("parallel",)),
    )(A, B, bias_row)

    # ---- interleave the 4 parity classes back into the dense NCHW output -----------
    # Y[n, i, j, qh, qw, co] is output pixel (2i + qh - 1, 2j + qw - 1).
    # Single transpose straight to NCHW, then drop the two invalid leading edges.
    Y = Y[:M].reshape(N, Hp, Wp, 2, 2, Cout)
    Y = Y.transpose(0, 5, 1, 3, 2, 4).reshape(N, Cout, 2 * Hp, 2 * Wp)
    return Y[:, :, 1:, 1:]


def reference_forward(x, w_t, bias):
    """Pure-JAX reference (conv_general_dilated with lhs_dilation == conv-transpose)."""
    k, s, p, op = KERNEL_SIZE, STRIDE, PADDING, OUTPUT_PADDING
    w_conv = jnp.flip(w_t, axis=(2, 3)).transpose(1, 0, 2, 3)
    y = lax.conv_general_dilated(
        x, w_conv, window_strides=(1, 1),
        padding=[(k - 1 - p, k - 1 - p + op)] * 2,
        lhs_dilation=(s, s),
        dimension_numbers=("NCHW", "OIHW", "NCHW"))
    y = y + bias.reshape(1, -1, 1, 1)
    z = y * jnp.tanh(jnp.logaddexp(y, 0.0))        # mish
    return jnp.clip(z + ADD_VALUE, -1.0, 1.0) * SCALE


if __name__ == "__main__":
    key = jax.random.PRNGKey(0)
    kx, kw, kb = jax.random.split(key, 3)

    # small, deterministic inputs consistent with the module's channel counts
    N, H, W = 2, 16, 16
    x = jax.random.normal(kx, (N, IN_CHANNELS, H, W), dtype=jnp.float32)

    # ConvTranspose2d params: weight (Cin, Cout, K, K), bias (Cout,)
    fan_in = IN_CHANNELS * KERNEL_SIZE * KERNEL_SIZE
    bound = 1.0 / np.sqrt(fan_in)
    w_t = jax.random.uniform(kw, (IN_CHANNELS, OUT_CHANNELS, KERNEL_SIZE, KERNEL_SIZE),
                             minval=-bound, maxval=bound, dtype=jnp.float32)
    bias = jax.random.uniform(kb, (OUT_CHANNELS,), minval=-bound, maxval=bound,
                              dtype=jnp.float32)

    out = jax.jit(model_forward)(x, w_t, bias)
    out = jax.block_until_ready(out)

    ref = jax.block_until_ready(reference_forward(x, w_t, bias))
    assert out.shape == ref.shape == (N, OUT_CHANNELS, 2 * H + 1, 2 * W + 1)
    np.testing.assert_allclose(np.asarray(out), np.asarray(ref), atol=2e-4, rtol=2e-4)

    print("KERNEL_OK")
</pallas_src>

<mosaic_0001>
module attributes {stable_mosaic.version = 11 : i64} {
  func.func @_fused_gemm_act_kernel(%arg0: i32, %arg1: memref<296x128xf32, #tpu.memory_space<vmem>>, %arg2: memref<128x256xf32, #tpu.memory_space<vmem>>, %arg3: memref<1x256xf32, #tpu.memory_space<vmem>>, %arg4: memref<296x256xf32, #tpu.memory_space<vmem>>) attributes {dimension_semantics = [#tpu.dimension_semantics<parallel>], iteration_bounds = array<i64: 2>, scalar_prefetch = 0 : i64, scratch_operands = 0 : i64, tpu.core_type = #tpu.core_type<tc>, window_params = [{transform_indices = @transform_0, window_bounds = array<i64: 296, 128>}, {pipeline_mode = #tpu.pipeline_mode<synchronous>, transform_indices = @transform_1, window_bounds = array<i64: 128, 256>}, {pipeline_mode = #tpu.pipeline_mode<synchronous>, transform_indices = @transform_2, window_bounds = array<i64: 1, 256>}, {transform_indices = @transform_3, window_bounds = array<i64: 296, 256>}]} {
    %c0 = arith.constant 0 : index
    %c0_0 = arith.constant 0 : index
    %0 = vector.load %arg1[%c0, %c0_0] : memref<296x128xf32, #tpu.memory_space<vmem>>, vector<296x128xf32>
    %c0_1 = arith.constant 0 : index
    %c0_2 = arith.constant 0 : index
    %1 = vector.load %arg2[%c0_1, %c0_2] : memref<128x256xf32, #tpu.memory_space<vmem>>, vector<128x256xf32>
    %cst = arith.constant dense<0.000000e+00> : vector<296x256xf32>
    %2 = tpu.matmul %0, %1, %cst {dimension_numbers = #tpu.dot_dimension_numbers<[1], [0], [0], [1], [0, 0, 1, 1], [], []>} : vector<296x128xf32>, vector<128x256xf32>, vector<296x256xf32> -> vector<296x256xf32>
    %c0_3 = arith.constant 0 : index
    %c0_4 = arith.constant 0 : index
    %3 = vector.load %arg3[%c0_3, %c0_4] : memref<1x256xf32, #tpu.memory_space<vmem>>, vector<1x256xf32>
    %4 = vector.broadcast %3 : vector<1x256xf32> to vector<296x256xf32>
    %5 = arith.addf %2, %4 : vector<296x256xf32>
    %cst_5 = arith.constant 2.000000e+01 : f32
    %6 = vector.broadcast %cst_5 : f32 to vector<296x256xf32>
    %7 = arith.minimumf %5, %6 : vector<296x256xf32>
    %8 = math.exp %7 : vector<296x256xf32>
    %cst_6 = arith.constant 2.000000e+00 : f32
    %9 = vector.broadcast %cst_6 : f32 to vector<296x256xf32>
    %10 = arith.addf %8, %9 : vector<296x256xf32>
    %11 = arith.mulf %8, %10 : vector<296x256xf32>
    %cst_7 = arith.constant 2.000000e+00 : f32
    %12 = vector.broadcast %cst_7 : f32 to vector<296x256xf32>
    %13 = arith.addf %11, %12 : vector<296x256xf32>
    %14 = arith.divf %11, %13 : vector<296x256xf32>
    %15 = arith.mulf %5, %14 : vector<296x256xf32>
    %cst_8 = arith.constant 5.000000e-01 : f32
    %16 = vector.broadcast %cst_8 : f32 to vector<296x256xf32>
    %17 = arith.addf %15, %16 : vector<296x256xf32>
    %cst_9 = arith.constant -1.000000e+00 : f32
    %cst_10 = arith.constant 1.000000e+00 : f32
    %18 = vector.broadcast %cst_9 : f32 to vector<296x256xf32>
    %19 = arith.maximumf %18, %17 : vector<296x256xf32>
    %20 = vector.broadcast %cst_10 : f32 to vector<296x256xf32>
    %21 = arith.minimumf %20, %19 : vector<296x256xf32>
    %cst_11 = arith.constant 2.000000e+00 : f32
    %22 = vector.broadcast %cst_11 : f32 to vector<296x256xf32>
    %23 = arith.mulf %21, %22 : vector<296x256xf32>
    %c0_12 = arith.constant 0 : index
    %c0_13 = arith.constant 0 : index
    %24 = vector.load %arg4[%c0_12, %c0_13] : memref<296x256xf32, #tpu.memory_space<vmem>>, vector<296x256xf32>
    tpu.vector_store %arg4[%c0_12, %c0_13], %23 {strides = array<i32>} : memref<296x256xf32, #tpu.memory_space<vmem>>, vector<296x256xf32>,
    return
  }
  func.func @transform_0(%arg0: i32) -> (i32, i32) {
    %c0_i32 = arith.constant 0 : i32
    %c0_i32_0 = arith.constant 0 : i32
    return %arg0, %c0_i32 : i32, i32
  }
  func.func @transform_1(%arg0: i32) -> (i32, i32) {
    %c0_i32 = arith.constant 0 : i32
    %c0_i32_0 = arith.constant 0 : i32
    %c0_i32_1 = arith.constant 0 : i32
    return %c0_i32, %c0_i32_0 : i32, i32
  }
  func.func @transform_2(%arg0: i32) -> (i32, i32) {
    %c0_i32 = arith.constant 0 : i32
    %c0_i32_0 = arith.constant 0 : i32
    %c0_i32_1 = arith.constant 0 : i32
    return %c0_i32, %c0_i32_0 : i32, i32
  }
  func.func @transform_3(%arg0: i32) -> (i32, i32) {
    %c0_i32 = arith.constant 0 : i32
    %c0_i32_0 = arith.constant 0 : i32
    return %arg0, %c0_i32 : i32, i32
  }
}

</mosaic_0001>

<bundles_post_ra>
// kernel: tile.9
= control target key start
LH: loop header
LB: loop body
LE: loop exit
PB: predicated region body
PF: predicated region fallthrough
CT: control target
= control target key end

     0   :  { %s7_s8 = smov 3  ;;  %vm9_vm0 = vcmask 523264   ;;  %s34_s9 = smov 64   ;;  %vm16_vm1 = vcmask 1048064   ;;  %s54_s0 = inlined_call_operand.vmem [shape: f32[4,64], index: 0, kind: input, shape index: {}]   ;;  %s55_s1 = inlined_call_operand.vmem [shape: f32[1,256], index: 1, kind: output, shape index: {}]  }
   0x1   :  { %v5_v0 = vld [vmem:[%s54_s0] sm:$0xf]  ;;  %s12_s0 = smov 3 }
   0x2   :  { %6 = vst [vmem:[#allocation1] sm:$0xf] %v5_v0 }
   0x9   :  { %v13_v1 = vld [vmem:[#allocation1 + $0x1] ss:$2 sm:%s12_s0]   ;;  %v8_v2 = vld [vmem:[#allocation1] ss:$2 sm:%s7_s8]  }
   0xa   :  { %14 = vrot.lane.b32.xlu0 %v13_v1, %s34_s9  ;;  %10 = vst.msk [vmem:[#allocation0] ss:$8 sm:$0x3] %vm9_vm0, %v8_v2  }
  0x7c   :  { %v15_v3 = vpop.permute.xlu0 %14  }
  0x7d   :  { %17 = vst.msk [vmem:[#allocation0] ss:$8 sm:$0x3] %vm16_vm1, %v15_v3  }
  0x84   :  { %v22_v4 = vld [vmem:[#allocation0] sm:$0x1]  ;;  %v27_v5 = vld [vmem:[#allocation0 + $0x8] sm:$0x1] }
  0x85   :  { %25 = vst [vmem:[%s55_s1] sm:$0x1] %v22_v4  ;;  %32 = vst [vmem:[%s55_s1 + $0x1] sm:$0x1] %v27_v5 }

// kernel: tile.8
= control target key start
LH: loop header
LB: loop body
LE: loop exit
PB: predicated region body
PF: predicated region fallthrough
CT: control target
= control target key end

     0   :  { %2 = vsyncpa [#allocation1], 0  ;;  %s42_s6 = smov [#allocation0]   ;;  %s59_s0 = inlined_call_operand.hbm [shape: f32[64], index: 0, kind: input, shape index: {}]   ;;  %s60_s1 = inlined_call_operand.vmem [shape: f32[4,64], index: 1, kind: output, shape index: {}]  }
   0x1   :  { %s9_s7 = sshll.u32 %s42_s6, 4  ;;  %s10_s7 = int_to_ptr.vmem [resolvable:$true] %s9_s7 }
   0x2   :  { %s28_s8 = scalar_lea.vmem %s10_s7, 16  ;;  %s32_s9 = scalar_lea.vmem %s10_s7, 32 }
   0x3   :  { %p29_p0 = scmp.ne.s32.totalorder %s10_s7, %s28_s8  ;;  %p33_p1 = scmp.lt.s32.totalorder %s10_s7, %s10_s7 }
   0x4   :  { %p34_p2 = scmp.lt.s32.totalorder %s32_s9, %s28_s8 }
   0x6   :  { %p35_p3 = por %p34_p2, %p33_p1 }
   0x8   :  { %p36_p4 = pnand %p35_p3, %p29_p0 }
   0xa   :  { %39 = shalt.err (!%p36_p4)
}
   0xb   :  { %12 = dma.hbm_to_vmem [thread:$0]  %s59_s0, 16, %s10_s7, [#allocation1]  }
   0xc   :  { %40 = dma.done.wait [#allocation1], 16  }
   0xd   :  { %41 = vsyncadd [#allocation1], 4294967280  ;;  %v16_v0 = vld [vmem:[#allocation0] ss:$0 sm:$0xff] }
   0xe   :  { %17 = vst [vmem:[%s60_s1] sm:$0xf] %v16_v0 }
   0xf   :  { %18 = vsyncpa [#allocation1], 1 }

// kernel: model_forward.1
= control target key start
LH: loop header
LB: loop body
LE: loop exit
PB: predicated region body
PF: predicated region fallthrough
CT: control target
= control target key end

     0   :  { %s2089_s12 = smov 0   ;;  %s3095_s0 = inlined_call_operand.vmem [shape: f32[592,128], index: 0, kind: input, shape index: {}]   ;;  %s3096_s1 = inlined_call_operand.vmem [shape: f32[128,256], index: 1, kind: input, shape index: {}]   ;;  %s3097_s2 = inlined_call_operand.vmem [shape: f32[1,256], index: 2, kind: input, shape index: {}]   ;;  %s3098_s3 = inlined_call_operand.vmem [shape: f32[592,256], index: 3, kind: output, shape index: {}]  }
   0x1 LB: > { %s1638_s13 = sadd.s32 4294967295, %s2066_s12   ;;  %p1642_p0 = scmp.ge.s32.totalorder %s2066_s12, 1  ;;  %s2066_s12 = sphi %s2089_s12, %s13_s12  }
   0x2   : > { %p138_p1 = scmp.lt.s32.totalorder %s2066_s12, 3 }
   0x4   : > { %p139_p2 = pnand %p1642_p0, %p138_p1 }
   0x5   : > { %s163_s21 = smul.u32 (!%p139_p2), 37, %s1638_s13 }
   0x6   : > { %142 = sbr.rel (%p139_p2) target bundleno = 495 (0x1ef), region = 32 }
   0x7   : > { %p164_p3 = scmp.lt.s32.totalorder (!%p139_p2), %s163_s21, 73 }
   0xb   : > { %v244_v0 = vld [vmem:[%s3096_s1 + $0xf8] sm:$0xff]  ;;  %v243_v1 = vld [vmem:[%s3096_s1 + $0xf0] sm:$0xff]  ;;  %v242_v2 = vld [vmem:[%s3096_s1 + $0xe8] sm:$0xff]  ;;  %s3100_s21 = smov (!%p164_p3, %s163_s21), 73  ;;  %v2068_v34 = vmov 0.0  }
   0xc   : > { %257 = vmatprep.subr.mxu0 %v244_v0  ;;  %1723 = vmatprep.subr.mxu1 %v244_v0  ;;  %v241_v3 = vld [vmem:[%s3096_s1 + $0xe0] sm:$0xff]  ;;  %v240_v4 = vld [vmem:[%s3096_s1 + $0xd8] sm:$0xff]  ;;  %v239_v5 = vld [vmem:[%s3096_s1 + $0xd0] sm:$0xff]  ;;  %s1643_s20 = sshll.u32 %s3100_s21, 3  ;;  %s1722_s7 = sshll.u32 %s3100_s21, 4 }
   0xd   : > { %258 = vmatpush1.msra.mxu0 %v243_v1  ;;  %1739 = vmatpush1.msra.mxu1 %v243_v1  ;;  %v238_v6 = vld [vmem:[%s3096_s1 + $0xc8] sm:$0xff]  ;;  %v237_v7 = vld [vmem:[%s3096_s1 + $0xc0] sm:$0xff]  ;;  %v236_v8 = vld [vmem:[%s3096_s1 + $0xb8] sm:$0xff]  ;;  %s2198_s29 = scalar_lea.vmem %s3095_s0, %s1643_s20  ;;  %s2443_s9 = scalar_lea.vmem %s3098_s3, %s1722_s7 }
   0xe   : > { %259 = vmatprep.subr.mxu0 %v242_v2  ;;  %1724 = vmatprep.subr.mxu1 %v242_v2  ;;  %v235_v9 = vld [vmem:[%s3096_s1 + $0xb0] sm:$0xff]  ;;  %v234_v10 = vld [vmem:[%s3096_s1 + $0xa8] sm:$0xff]  ;;  %v233_v11 = vld [vmem:[%s3096_s1 + $0xa0] sm:$0xff] }
   0xf   : > { %260 = vmatpush1.msra.mxu0 %v241_v3  ;;  %1740 = vmatpush1.msra.mxu1 %v241_v3  ;;  %v232_v12 = vld [vmem:[%s3096_s1 + $0x98] sm:$0xff]  ;;  %v231_v13 = vld [vmem:[%s3096_s1 + $0x90] sm:$0xff]  ;;  %v230_v14 = vld [vmem:[%s3096_s1 + $0x88] sm:$0xff] }
  0x10   : > { %261 = vmatprep.subr.mxu0 %v240_v4  ;;  %1725 = vmatprep.subr.mxu1 %v240_v4  ;;  %v229_v15 = vld [vmem:[%s3096_s1 + $0x80] sm:$0xff]  ;;  %v228_v16 = vld [vmem:[%s3096_s1 + $0x78] sm:$0xff]  ;;  %v227_v17 = vld [vmem:[%s3096_s1 + $0x70] sm:$0xff] }
  0x11   : > { %262 = vmatpush1.msra.mxu0 %v239_v5  ;;  %1741 = vmatpush1.msra.mxu1 %v239_v5  ;;  %v226_v18 = vld [vmem:[%s3096_s1 + $0x68] sm:$0xff]  ;;  %v225_v19 = vld [vmem:[%s3096_s1 + $0x60] sm:$0xff]  ;;  %v224_v20 = vld [vmem:[%s3096_s1 + $0x58] sm:$0xff] }
  0x12   : > { %263 = vmatprep.subr.mxu0 %v238_v6  ;;  %1726 = vmatprep.subr.mxu1 %v238_v6  ;;  %v223_v21 = vld [vmem:[%s3096_s1 + $0x50] sm:$0xff]  ;;  %v222_v22 = vld [vmem:[%s3096_s1 + $0x48] sm:$0xff]  ;;  %v221_v23 = vld [vmem:[%s3096_s1 + $0x40] sm:$0xff]  ;;  %v247_v6 = vlaneseq }
  0x13   : > { %264 = vmatpush1.msra.mxu0 %v237_v7  ;;  %1742 = vmatpush1.msra.mxu1 %v237_v7  ;;  %v220_v24 = vld [vmem:[%s3096_s1 + $0x38] sm:$0xff]  ;;  %v219_v25 = vld [vmem:[%s3096_s1 + $0x30] sm:$0xff]  ;;  %v218_v26 = vld [vmem:[%s3096_s1 + $0x28] sm:$0xff] }
  0x14   : > { %265 = vmatprep.subr.mxu0 %v236_v8  ;;  %1727 = vmatprep.subr.mxu1 %v236_v8  ;;  %v217_v27 = vld [vmem:[%s3096_s1 + $0x20] sm:$0xff]  ;;  %v216_v28 = vld [vmem:[%s3096_s1 + $0x18] sm:$0xff]  ;;  %v215_v29 = vld [vmem:[%s3096_s1 + $0x10] sm:$0xff]  ;;  %v248_v7 = vshrl.u32 %v247_v6, 7 }
  0x15   : > { %266 = vmatpush1.msra.mxu0 %v235_v9  ;;  %1743 = vmatpush1.msra.mxu1 %v235_v9  ;;  %v214_v30 = vld [vmem:[%s3096_s1 + $0x8] sm:$0xff]  ;;  %v213_v31 = vld [vmem:[%s3096_s1] sm:$0xff]  ;;  %v195_v33 = vld [vmem:[%s2198_s29 + $0x98] sm:$0xff] }
  0x16   : > { %267 = vmatprep.subr.mxu0 %v234_v10  ;;  %1728 = vmatprep.subr.mxu1 %v234_v10  ;;  %v176_v32 = vld [vmem:[%s2198_s29] sm:$0xff]  ;;  %v177_v35 = vld [vmem:[%s2198_s29 + $0x8] sm:$0xff]  ;;  %v178_v37 = vld [vmem:[%s2198_s29 + $0x10] sm:$0xff]  ;;  %v249_v8 = vsub.s32 0, %v248_v7  ;;  %v253_v10 = vsub.s32 1, %v248_v7 }
  0x17   : > { %268 = vmatpush1.msra.mxu0 %v233_v11  ;;  %1744 = vmatpush1.msra.mxu1 %v233_v11  ;;  %v196_v36 = vld [vmem:[%s2198_s29 + $0xa0] sm:$0xff]  ;;  %v197_v38 = vld [vmem:[%s2198_s29 + $0xa8] sm:$0xff]  ;;  %v179_v39 = vld [vmem:[%s2198_s29 + $0x18] sm:$0xff] }
  0x18   : > { %269 = vmatprep.subr.mxu0 %v232_v12  ;;  %1729 = vmatprep.subr.mxu1 %v232_v12  ;;  %v198_v40 = vld [vmem:[%s2198_s29 + $0xb0] sm:$0xff]  ;;  %v180_v41 = vld [vmem:[%s2198_s29 + $0x20] sm:$0xff]  ;;  %v199_v42 = vld [vmem:[%s2198_s29 + $0xb8] sm:$0xff] }
  0x19   : > { %270 = vmatpush1.msra.mxu0 %v231_v13  ;;  %1745 = vmatpush1.msra.mxu1 %v231_v13  ;;  %v181_v43 = vld [vmem:[%s2198_s29 + $0x28] sm:$0xff]  ;;  %v200_v44 = vld [vmem:[%s2198_s29 + $0xc0] sm:$0xff]  ;;  %v182_v45 = vld [vmem:[%s2198_s29 + $0x30] sm:$0xff] }
  0x1a   : > { %271 = vmatprep.subr.mxu0 %v230_v14  ;;  %1730 = vmatprep.subr.mxu1 %v230_v14  ;;  %v201_v46 = vld [vmem:[%s2198_s29 + $0xc8] sm:$0xff]  ;;  %v183_v47 = vld [vmem:[%s2198_s29 + $0x38] sm:$0xff]  ;;  %v202_v48 = vld [vmem:[%s2198_s29 + $0xd0] sm:$0xff] }
  0x1b   : > { %272 = vmatpush1.msra.mxu0 %v229_v15  ;;  %1746 = vmatpush1.msra.mxu1 %v229_v15  ;;  %v184_v49 = vld [vmem:[%s2198_s29 + $0x40] sm:$0xff]  ;;  %v203_v50 = vld [vmem:[%s2198_s29 + $0xd8] sm:$0xff]  ;;  %v185_v51 = vld [vmem:[%s2198_s29 + $0x48] sm:$0xff] }
  0x1c   : > { %273 = vmatprep.subr.mxu0 %v228_v16  ;;  %1731 = vmatprep.subr.mxu1 %v228_v16  ;;  %v204_v52 = vld [vmem:[%s2198_s29 + $0xe0] sm:$0xff]  ;;  %v186_v53 = vld [vmem:[%s2198_s29 + $0x50] sm:$0xff]  ;;  %v205_v54 = vld [vmem:[%s2198_s29 + $0xe8] sm:$0xff] }
  0x1d   : > { %274 = vmatpush1.msra.mxu0 %v227_v17  ;;  %1747 = vmatpush1.msra.mxu1 %v227_v17  ;;  %v187_v55 = vld [vmem:[%s2198_s29 + $0x58] sm:$0xff]  ;;  %v206_v56 = vld [vmem:[%s2198_s29 + $0xf0] sm:$0xff]  ;;  %v188_v57 = vld [vmem:[%s2198_s29 + $0x60] sm:$0xff] }
  0x1e   : > { %275 = vmatprep.subr.mxu0 %v226_v18  ;;  %1732 = vmatprep.subr.mxu1 %v226_v18  ;;  %v207_v58 = vld [vmem:[%s2198_s29 + $0xf8] sm:$0xff]  ;;  %v189_v59 = vld [vmem:[%s2198_s29 + $0x68] sm:$0xff]  ;;  %v208_v60 = vld [vmem:[%s2198_s29 + $0x100] sm:$0xff] }
  0x1f   : > { %276 = vmatpush1.msra.mxu0 %v225_v19  ;;  %1748 = vmatpush1.msra.mxu1 %v225_v19  ;;  %v190_v61 = vld [vmem:[%s2198_s29 + $0x70] sm:$0xff]  ;;  %v209_v62 = vld [vmem:[%s2198_s29 + $0x108] sm:$0xff]  ;;  %v191_v63 = vld [vmem:[%s2198_s29 + $0x78] sm:$0xff] }
  0x20   : > { %277 = vmatprep.subr.mxu0 %v224_v20  ;;  %1733 = vmatprep.subr.mxu1 %v224_v20  ;;  %v210_v0 = vld [vmem:[%s2198_s29 + $0x110] sm:$0xff]  ;;  %v192_v1 = vld [vmem:[%s2198_s29 + $0x80] sm:$0xff]  ;;  %v211_v2 = vld [vmem:[%s2198_s29 + $0x118] sm:$0xff] }
  0x21   : > { %278 = vmatpush1.msra.mxu0 %v223_v21  ;;  %1749 = vmatpush1.msra.mxu1 %v223_v21  ;;  %v193_v3 = vld [vmem:[%s2198_s29 + $0x88] sm:$0xff]  ;;  %v212_v4 = vld [vmem:[%s2198_s29 + $0x120] sm:$0xff]  ;;  %v194_v5 = vld [vmem:[%s2198_s29 + $0x90] sm:$0xff] }
  0x22   : > { %279 = vmatprep.subr.mxu0 %v222_v22  ;;  %1734 = vmatprep.subr.mxu1 %v222_v22  ;;  %v245_v9 = vld [vmem:[%s3097_s2] sm:$0x3] }
  0x23   : > { %280 = vmatpush1.msra.mxu0 %v221_v23  ;;  %1750 = vmatpush1.msra.mxu1 %v221_v23  ;;  %v2280_v11 = vrot.slane %v245_v9, %v249_v8  ;;  %v2282_v12 = vrot.slane %v245_v9, %v253_v10 }
  0x24   : > { %281 = vmatprep.subr.mxu0 %v220_v24  ;;  %1735 = vmatprep.subr.mxu1 %v220_v24 }
  0x25   : > { %282 = vmatpush1.msra.mxu0 %v219_v25  ;;  %1751 = vmatpush1.msra.mxu1 %v219_v25 }
  0x26   : > { %283 = vmatprep.subr.mxu0 %v218_v26  ;;  %1736 = vmatprep.subr.mxu1 %v218_v26 }
  0x27   : > { %284 = vmatpush1.msra.mxu0 %v217_v27  ;;  %1752 = vmatpush1.msra.mxu1 %v217_v27 }
  0x28   : > { %285 = vmatprep.subr.mxu0 %v216_v28  ;;  %1737 = vmatprep.subr.mxu1 %v216_v28 }
  0x29   : > { %286 = vmatpush1.msra.mxu0 %v215_v29  ;;  %1753 = vmatpush1.msra.mxu1 %v215_v29 }
  0x2a   : > { %287 = vmatprep.subr.mxu0 %v214_v30  ;;  %1738 = vmatprep.subr.mxu1 %v214_v30 }
  0x2b   : > { %288 = vmatpush1.msra.mxu0 %v213_v31  ;;  %1754 = vmatpush1.msra.mxu1 %v213_v31 }
  0x2c   : > { %321 = vmatprep.mubr.f32.mxu0 %v2068_v34  ;;  %435 = vmatprep.mubr.f32.mxu1 %v2068_v34 }
  0x2d   : > { %322 = vmatmul.mubr.f32.vlgmr.msra.gmra.mxu0 %v176_v32  ;;  %436 = vmatmul.mubr.f32.vlgmr.msra.gmra.mxu1 %v195_v33 }
  0x2e   : > { %327 = vmatprep.mubr.f32.mxu0 %v2068_v34  ;;  %441 = vmatprep.mubr.f32.mxu1 %v2068_v34 }
  0x31   : > { %328 = vmatmul.mubr.f32.gmra.mxu0 %v177_v35  ;;  %442 = vmatmul.mubr.f32.gmra.mxu1 %v196_v36 }
  0x32   : > { %333 = vmatprep.mubr.f32.mxu0 %v2068_v34  ;;  %447 = vmatprep.mubr.f32.mxu1 %v2068_v34 }
  0x35   : > { %334 = vmatmul.mubr.f32.gmra.mxu0 %v178_v37  ;;  %448 = vmatmul.mubr.f32.gmra.mxu1 %v197_v38 }
  0x36   : > { %339 = vmatprep.mubr.f32.mxu0 %v2068_v34  ;;  %453 = vmatprep.mubr.f32.mxu1 %v2068_v34 }
  0x39   : > { %340 = vmatmul.mubr.f32.gmra.mxu0 %v179_v39  ;;  %454 = vmatmul.mubr.f32.gmra.mxu1 %v198_v40 }
  0x3a   : > { %345 = vmatprep.mubr.f32.mxu0 %v2068_v34  ;;  %459 = vmatprep.mubr.f32.mxu1 %v2068_v34 }
  0x3d   : > { %346 = vmatmul.mubr.f32.gmra.mxu0 %v180_v41  ;;  %460 = vmatmul.mubr.f32.gmra.mxu1 %v199_v42 }
  0x3e   : > { %351 = vmatprep.mubr.f32.mxu0 %v2068_v34  ;;  %465 = vmatprep.mubr.f32.mxu1 %v2068_v34 }
  0x41   : > { %352 = vmatmul.mubr.f32.gmra.mxu0 %v181_v43  ;;  %466 = vmatmul.mubr.f32.gmra.mxu1 %v200_v44 }
  0x42   : > { %357 = vmatprep.mubr.f32.mxu0 %v2068_v34  ;;  %471 = vmatprep.mubr.f32.mxu1 %v2068_v34 }
  0x45   : > { %358 = vmatmul.mubr.f32.gmra.mxu0 %v182_v45  ;;  %472 = vmatmul.mubr.f32.gmra.mxu1 %v201_v46 }
  0x46   : > { %363 = vmatprep.mubr.f32.mxu0 %v2068_v34  ;;  %477 = vmatprep.mubr.f32.mxu1 %v2068_v34 }
  0x49   : > { %364 = vmatmul.mubr.f32.gmra.mxu0 %v183_v47  ;;  %478 = vmatmul.mubr.f32.gmra.mxu1 %v202_v48 }
  0x4a   : > { %369 = vmatprep.mubr.f32.mxu0 %v2068_v34  ;;  %483 = vmatprep.mubr.f32.mxu1 %v2068_v34 }
  0x4d   : > { %370 = vmatmul.mubr.f32.gmra.mxu0 %v184_v49  ;;  %484 = vmatmul.mubr.f32.gmra.mxu1 %v203_v50 }
  0x4e   : > { %375 = vmatprep.mubr.f32.mxu0 %v2068_v34  ;;  %489 = vmatprep.mubr.f32.mxu1 %v2068_v34 }
  0x51   : > { %376 = vmatmul.mubr.f32.gmra.mxu0 %v185_v51  ;;  %490 = vmatmul.mubr.f32.gmra.mxu1 %v204_v52 }
  0x52   : > { %381 = vmatprep.mubr.f32.mxu0 %v2068_v34  ;;  %495 = vmatprep.mubr.f32.mxu1 %v2068_v34 }
  0x55   : > { %382 = vmatmul.mubr.f32.gmra.mxu0 %v186_v53  ;;  %496 = vmatmul.mubr.f32.gmra.mxu1 %v205_v54 }
  0x56   : > { %387 = vmatprep.mubr.f32.mxu0 %v2068_v34  ;;  %501 = vmatprep.mubr.f32.mxu1 %v2068_v34 }
  0x59   : > { %388 = vmatmul.mubr.f32.gmra.mxu0 %v187_v55  ;;  %502 = vmatmul.mubr.f32.gmra.mxu1 %v206_v56 }
  0x5a   : > { %393 = vmatprep.mubr.f32.mxu0 %v2068_v34  ;;  %507 = vmatprep.mubr.f32.mxu1 %v2068_v34 }
  0x5d   : > { %394 = vmatmul.mubr.f32.gmra.mxu0 %v188_v57  ;;  %508 = vmatmul.mubr.f32.gmra.mxu1 %v207_v58 }
  0x5e   : > { %399 = vmatprep.mubr.f32.mxu0 %v2068_v34  ;;  %513 = vmatprep.mubr.f32.mxu1 %v2068_v34 }
  0x61   : > { %400 = vmatmul.mubr.f32.gmra.mxu0 %v189_v59  ;;  %514 = vmatmul.mubr.f32.gmra.mxu1 %v208_v60 }
  0x62   : > { %405 = vmatprep.mubr.f32.mxu0 %v2068_v34  ;;  %519 = vmatprep.mubr.f32.mxu1 %v2068_v34 }
  0x65   : > { %406 = vmatmul.mubr.f32.gmra.mxu0 %v190_v61  ;;  %520 = vmatmul.mubr.f32.gmra.mxu1 %v209_v62 }
  0x66   : > { %411 = vmatprep.mubr.f32.mxu0 %v2068_v34  ;;  %525 = vmatprep.mubr.f32.mxu1 %v2068_v34 }
  0x69   : > { %412 = vmatmul.mubr.f32.gmra.mxu0 %v191_v63  ;;  %526 = vmatmul.mubr.f32.gmra.mxu1 %v210_v0 }
  0x6a   : > { %417 = vmatprep.mubr.f32.mxu0 %v2068_v34  ;;  %531 = vmatprep.mubr.f32.mxu1 %v2068_v34 }
  0x6d   : > { %418 = vmatmul.mubr.f32.gmra.mxu0 %v192_v1  ;;  %532 = vmatmul.mubr.f32.gmra.mxu1 %v211_v2 }
  0x6e   : > { %423 = vmatprep.mubr.f32.mxu0 %v2068_v34  ;;  %537 = vmatprep.mubr.f32.mxu1 %v2068_v34 }
  0x71   : > { %424 = vmatmul.mubr.f32.gmra.mxu0 %v193_v3  ;;  %538 = vmatmul.mubr.f32.gmra.mxu1 %v212_v4 }
  0x72   : > { %429 = vmatprep.mubr.f32.mxu0 %v2068_v34 }
  0x75   : > { %430 = vmatmul.mubr.f32.gmra.mxu0 %v194_v5 }
  0xed   : > { %v323_v13 = vpop.f32.mrf.mxu0  ;;  %v437_v14 = vpop.f32.mrf.mxu1 }
  0xee   : > { %v2285_v15 = vadd.f32 %v323_v13, %v2280_v11  ;;  %v2288_v16 = vadd.f32 %v437_v14, %v2280_v11 }
  0xef   : > { %v325_v17 = vpop.f32.mrf.mxu0  ;;  %v439_v18 = vpop.f32.mrf.mxu1 }
  0xf0   : > { %v544_v19 = vmin.f32 %v2285_v15, 20.0  ;;  %v582_v20 = vmin.f32 %v2288_v16, 20.0  ;;  %v2293_v21 = vadd.f32 %v325_v17, %v2282_v12  ;;  %v2296_v22 = vadd.f32 %v439_v18, %v2282_v12 }
  0xf1   : > { %v329_v23 = vpop.f32.mrf.mxu0  ;;  %v443_v24 = vpop.f32.mrf.mxu1 }
  0xf2   : > { %v618_v25 = vmul.f32 1.442695, %v544_v19  ;;  %v694_v26 = vmul.f32 1.442695, %v582_v20  ;;  %v545_v27 = vmin.f32 %v2293_v21, 20.0  ;;  %v583_v28 = vmin.f32 %v2296_v22, 20.0 }
  0xf3   : > { %v2301_v29 = vadd.f32 %v329_v23, %v2280_v11  ;;  %v2304_v30 = vadd.f32 %v443_v24, %v2280_v11  ;;  %v331_v31 = vpop.f32.mrf.mxu0  ;;  %v445_v32 = vpop.f32.mrf.mxu1 }
  0xf4   : > { %1764 = vpow2.f32 %v618_v25  ;;  %v620_v33 = vmul.f32 1.442695, %v545_v27  ;;  %v696_v34 = vmul.f32 1.442695, %v583_v28  ;;  %v2307_v35 = vadd.f32 %v331_v31, %v2282_v12 }
  0xf5   : > { %1766 = vpow2.f32 %v694_v26  ;;  %v546_v36 = vmin.f32 %v2301_v29, 20.0  ;;  %v584_v37 = vmin.f32 %v2304_v30, 20.0  ;;  %v2312_v38 = vadd.f32 %v445_v32, %v2282_v12  ;;  %v335_v39 = vpop.f32.mrf.mxu0  ;;  %v449_v40 = vpop.f32.mrf.mxu1 }
  0xf6   : > { %1768 = vpow2.f32 %v620_v33  ;;  %v547_v41 = vmin.f32 %v2307_v35, 20.0  ;;  %v2316_v42 = vadd.f32 %v335_v39, %v2280_v11  ;;  %v2319_v43 = vadd.f32 %v449_v40, %v2280_v11 }
  0xf7   : > { %1770 = vpow2.f32 %v696_v34  ;;  %v622_v44 = vmul.f32 1.442695, %v546_v36  ;;  %v698_v45 = vmul.f32 1.442695, %v584_v37  ;;  %v585_v46 = vmin.f32 %v2312_v38, 20.0  ;;  %v337_v47 = vpop.f32.mrf.mxu0  ;;  %v451_v48 = vpop.f32.mrf.mxu1 }
  0xf8   : > { %v624_v49 = vmul.f32 1.442695, %v547_v41  ;;  %v548_v50 = vmin.f32 %v2316_v42, 20.0  ;;  %v586_v51 = vmin.f32 %v2319_v43, 20.0  ;;  %v2325_v52 = vadd.f32 %v337_v47, %v2282_v12 }
  0xf9   : > { %1772 = vpow2.f32 %v622_v44  ;;  %v700_v53 = vmul.f32 1.442695, %v585_v46  ;;  %v2328_v54 = vadd.f32 %v451_v48, %v2282_v12  ;;  %v341_v55 = vpop.f32.mrf.mxu0  ;;  %v455_v56 = vpop.f32.mrf.mxu1 }
  0xfa   : > { %1774 = vpow2.f32 %v698_v45  ;;  %v626_v57 = vmul.f32 1.442695, %v548_v50  ;;  %v702_v58 = vmul.f32 1.442695, %v586_v51  ;;  %v549_v59 = vmin.f32 %v2325_v52, 20.0 }
  0xfb   : > { %1776 = vpow2.f32 %v624_v49  ;;  %v587_v60 = vmin.f32 %v2328_v54, 20.0  ;;  %v2333_v61 = vadd.f32 %v341_v55, %v2280_v11  ;;  %v2336_v62 = vadd.f32 %v455_v56, %v2280_v11  ;;  %v343_v63 = vpop.f32.mrf.mxu0  ;;  %v457_v0 = vpop.f32.mrf.mxu1 }
  0xfc   : > { %1778 = vpow2.f32 %v700_v53  ;;  %v628_v1 = vmul.f32 1.442695, %v549_v59  ;;  %v2339_v2 = vadd.f32 %v343_v63, %v2282_v12  ;;  %v2342_v3 = vadd.f32 %v457_v0, %v2282_v12 }
  0xfd   : > { %1780 = vpow2.f32 %v626_v57  ;;  %v704_v4 = vmul.f32 1.442695, %v587_v60  ;;  %v550_v5 = vmin.f32 %v2333_v61, 20.0  ;;  %v588_v6 = vmin.f32 %v2336_v62, 20.0  ;;  %v347_v7 = vpop.f32.mrf.mxu0  ;;  %v461_v8 = vpop.f32.mrf.mxu1 }
  0xfe   : > { %1782 = vpow2.f32 %v702_v58  ;;  %v551_v9 = vmin.f32 %v2339_v2, 20.0  ;;  %v589_v10 = vmin.f32 %v2342_v3, 20.0  ;;  %v2349_v13 = vadd.f32 %v347_v7, %v2280_v11 }
  0xff   : > { %1784 = vpow2.f32 %v628_v1  ;;  %v630_v14 = vmul.f32 1.442695, %v550_v5  ;;  %v706_v17 = vmul.f32 1.442695, %v588_v6  ;;  %v2352_v18 = vadd.f32 %v461_v8, %v2280_v11  ;;  %v349_v19 = vpop.f32.mrf.mxu0  ;;  %v463_v20 = vpop.f32.mrf.mxu1 }
 0x100   : > { %1786 = vpow2.f32 %v704_v4  ;;  %v632_v23 = vmul.f32 1.442695, %v551_v9  ;;  %v708_v24 = vmul.f32 1.442695, %v589_v10  ;;  %v552_v25 = vmin.f32 %v2349_v13, 20.0 }
 0x101   : > { %v1765_v26 = vpop.eup %1764  ;;  %1788 = vpow2.f32 %v630_v14  ;;  %v590_v27 = vmin.f32 %v2352_v18, 20.0  ;;  %v2357_v28 = vadd.f32 %v349_v19, %v2282_v12  ;;  %v2360_v31 = vadd.f32 %v463_v20, %v2282_v12  ;;  %v353_v32 = vpop.f32.mrf.mxu0 }
 0x102   : > { %v1767_v33 = vpop.eup %1766  ;;  %v766_v34 = vadd.f32 2.0, %v1765_v26  ;;  %1790 = vpow2.f32 %v706_v17  ;;  %v634_v36 = vmul.f32 1.442695, %v552_v25  ;;  %v2363_v37 = vadd.f32 %v353_v32, %v2280_v11 }
 0x103   : > { %v1769_v39 = vpop.eup %1768  ;;  %v804_v40 = vadd.f32 2.0, %v1767_v33  ;;  %1792 = vpow2.f32 %v632_v23  ;;  %v710_v41 = vmul.f32 1.442695, %v590_v27  ;;  %v553_v44 = vmin.f32 %v2357_v28, 20.0 }
 0x104   : > { %v1771_v45 = vpop.eup %1770  ;;  %v2366_v46 = vmul.f32 %v1765_v26, %v766_v34  ;;  %v767_v47 = vadd.f32 2.0, %v1769_v39  ;;  %1794 = vpow2.f32 %v708_v24  ;;  %v591_v48 = vmin.f32 %v2360_v31, 20.0 }
 0x105   : > { %v2369_v49 = vmul.f32 %v1767_v33, %v804_v40  ;;  %v805_v50 = vadd.f32 2.0, %v1771_v45  ;;  %1796 = vpow2.f32 %v634_v36  ;;  %v636_v51 = vmul.f32 1.442695, %v553_v44 }
 0x106   : > { %v1773_v53 = vpop.eup %1772  ;;  %v914_v55 = vadd.f32 2.0, %v2366_v46  ;;  %v2372_v56 = vmul.f32 %v1769_v39, %v767_v47  ;;  %1798 = vpow2.f32 %v710_v41  ;;  %v712_v57 = vmul.f32 1.442695, %v591_v48 }
 0x107   : > { %v1775_v58 = vpop.eup %1774  ;;  %v952_v59 = vadd.f32 2.0, %v2369_v49  ;;  %v2375_v60 = vmul.f32 %v1771_v45, %v805_v50  ;;  %v768_v63 = vadd.f32 2.0, %v1773_v53  ;;  %1800 = vpow2.f32 %v636_v51 }
 0x108   : > { %v1777_v0 = vpop.eup %1776  ;;  %1802 = vrcp.f32 %v914_v55  ;;  %v915_v1 = vadd.f32 2.0, %v2372_v56  ;;  %v806_v4 = vadd.f32 2.0, %v1775_v58  ;;  %v554_v5 = vmin.f32 %v2363_v37, 20.0 }
 0x109   : > { %v1779_v6 = vpop.eup %1778  ;;  %1804 = vrcp.f32 %v952_v59  ;;  %v953_v7 = vadd.f32 2.0, %v2375_v60  ;;  %v2380_v8 = vmul.f32 %v1773_v53, %v768_v63  ;;  %v769_v9 = vadd.f32 2.0, %v1777_v0 }
 0x10a   : > { %v1781_v10 = vpop.eup %1780  ;;  %1806 = vrcp.f32 %v915_v1  ;;  %v2382_v14 = vmul.f32 %v1775_v58, %v806_v4  ;;  %v807_v17 = vadd.f32 2.0, %v1779_v6  ;;  %v2384_v19 = vmul.f32 1.442695, %v554_v5 }
 0x10b   : > { %v1783_v20 = vpop.eup %1782  ;;  %1808 = vrcp.f32 %v953_v7  ;;  %v916_v23 = vadd.f32 2.0, %v2380_v8  ;;  %v2387_v24 = vmul.f32 %v1777_v0, %v769_v9  ;;  %v770_v25 = vadd.f32 2.0, %v1781_v10 }
 0x10c   : > { %v1785_v26 = vpop.eup %1784  ;;  %v954_v27 = vadd.f32 2.0, %v2382_v14  ;;  %v2390_v32 = vmul.f32 %v1779_v6, %v807_v17  ;;  %v808_v33 = vadd.f32 2.0, %v1783_v20  ;;  %1810 = vpow2.f32 %v712_v57 }
 0x10d   : > { %v1787_v34 = vpop.eup %1786  ;;  %1812 = vrcp.f32 %v916_v23  ;;  %v917_v36 = vadd.f32 2.0, %v2387_v24  ;;  %v2393_v39 = vmul.f32 %v1781_v10, %v770_v25  ;;  %v771_v40 = vadd.f32 2.0, %v1785_v26 }
 0x10e   : > { %v1789_v41 = vpop.eup %1788  ;;  %1814 = vrcp.f32 %v954_v27  ;;  %v955_v44 = vadd.f32 2.0, %v2390_v32  ;;  %v2396_v45 = vmul.f32 %v1783_v20, %v808_v33  ;;  %v809_v47 = vadd.f32 2.0, %v1787_v34 }
 0x10f   : > { %v1791_v48 = vpop.eup %1790  ;;  %1816 = vrcp.f32 %v917_v36  ;;  %v918_v50 = vadd.f32 2.0, %v2393_v39  ;;  %v2399_v51 = vmul.f32 %v1785_v26, %v771_v40  ;;  %v772_v53 = vadd.f32 2.0, %v1789_v41 }
 0x110   : > { %v1793_v55 = vpop.eup %1792  ;;  %1818 = vrcp.f32 %v955_v44  ;;  %v956_v57 = vadd.f32 2.0, %v2396_v45  ;;  %v2402_v58 = vmul.f32 %v1787_v34, %v809_v47  ;;  %v810_v59 = vadd.f32 2.0, %v1791_v48 }
 0x111   : > { %v1795_v63 = vpop.eup %1794  ;;  %1820 = vrcp.f32 %v918_v50  ;;  %v919_v0 = vadd.f32 2.0, %v2399_v51  ;;  %v2405_v1 = vmul.f32 %v1789_v41, %v772_v53  ;;  %v773_v4 = vadd.f32 2.0, %v1793_v55 }
 0x112   : > { %v1797_v5 = vpop.eup %1796  ;;  %1822 = vrcp.f32 %v956_v57  ;;  %v957_v6 = vadd.f32 2.0, %v2402_v58  ;;  %v2408_v7 = vmul.f32 %v1791_v48, %v810_v59  ;;  %v811_v9 = vadd.f32 2.0, %v1795_v63 }
 0x113   : > { %v1799_v10 = vpop.eup %1798  ;;  %1824 = vrcp.f32 %v919_v0  ;;  %v920_v17 = vadd.f32 2.0, %v2405_v1  ;;  %v2411_v20 = vmul.f32 %v1793_v55, %v773_v4  ;;  %v774_v23 = vadd.f32 2.0, %v1797_v5 }
 0x114   : > { %v1801_v25 = vpop.eup %1800  ;;  %1826 = vrcp.f32 %v957_v6  ;;  %v958_v26 = vadd.f32 2.0, %v2408_v7  ;;  %v2414_v27 = vmul.f32 %v1795_v63, %v811_v9  ;;  %v812_v33 = vadd.f32 2.0, %v1799_v10 }
 0x115   : > { %v1803_v34 = vpop.eup %1802  ;;  %1828 = vrcp.f32 %v920_v17  ;;  %v921_v36 = vadd.f32 2.0, %v2411_v20  ;;  %v2417_v40 = vmul.f32 %v1797_v5, %v774_v23  ;;  %v775_v41 = vadd.f32 2.0, %v1801_v25 }
 0x116   : > { %v1805_v44 = vpop.eup %1804  ;;  %v989_v47 = vmul.f32 %v1803_v34, %v2366_v46  ;;  %1830 = vrcp.f32 %v958_v26  ;;  %v959_v48 = vadd.f32 2.0, %v2414_v27  ;;  %v2421_v50 = vmul.f32 %v1799_v10, %v812_v33 }
 0x117   : > { %v1807_v53 = vpop.eup %1806  ;;  %v1065_v55 = vmul.f32 %v1805_v44, %v2369_v49  ;;  %1832 = vrcp.f32 %v921_v36  ;;  %v922_v57 = vadd.f32 2.0, %v2417_v40  ;;  %v2425_v59 = vmul.f32 %v1801_v25, %v775_v41 }
 0x118   : > { %v1809_v63 = vpop.eup %1808  ;;  %v1136_v0 = vmul.f32 %v989_v47, %v2285_v15  ;;  %v991_v4 = vmul.f32 %v1807_v53, %v2372_v56  ;;  %1834 = vrcp.f32 %v959_v48  ;;  %v960_v46 = vadd.f32 2.0, %v2421_v50  ;;  %v2447_v48 = vpop.f32.mrf.mxu1 }
 0x119   : > { %v1811_v5 = vpop.eup %1810  ;;  %v1174_v6 = vmul.f32 %v1065_v55, %v2288_v16  ;;  %v1067_v9 = vmul.f32 %v1809_v63, %v2375_v60  ;;  %1836 = vrcp.f32 %v922_v57  ;;  %v923_v49 = vadd.f32 2.0, %v2425_v59 }
 0x11a   : > { %v1813_v10 = vpop.eup %1812  ;;  %v1210_v17 = vadd.f32 0.5, %v1136_v0  ;;  %v1137_v23 = vmul.f32 %v991_v4, %v2293_v21  ;;  %1838 = vrcp.f32 %v960_v46  ;;  %v813_v15 = vadd.f32 2.0, %v1811_v5 }
 0x11b   : > { %v1815_v25 = vpop.eup %1814  ;;  %v1248_v56 = vadd.f32 0.5, %v1174_v6  ;;  %v1175_v26 = vmul.f32 %v1067_v9, %v2296_v22  ;;  %v993_v33 = vmul.f32 %v1813_v10, %v2380_v8  ;;  %1840 = vrcp.f32 %v923_v49 }
 0x11c   : > { %v1817_v16 = vpop.eup %1816  ;;  %v1646_v34 = vclamps-f32 %v1210_v17, 1.0  ;;  %v1211_v60 = vadd.f32 0.5, %v1137_v23  ;;  %v1069_v36 = vmul.f32 %v1815_v25, %v2382_v14  ;;  %v2438_v41 = vmul.f32 %v1811_v5, %v813_v15 }
 0x11d   : > { %v1819_v44 = vpop.eup %1818  ;;  %v1684_v21 = vclamps-f32 %v1248_v56, 1.0  ;;  %v1249_v47 = vadd.f32 0.5, %v1175_v26  ;;  %v1138_v22 = vmul.f32 %v993_v33, %v2301_v29  ;;  %v995_v8 = vmul.f32 %v1817_v16, %v2387_v24  ;;  %v2452_v29 = vpop.f32.mrf.mxu0 }
 0x11e   : > { %v1821_v53 = vpop.eup %1820  ;;  %v1432_v55 = vmul.f32 2.0, %v1646_v34  ;;  %v1647_v14 = vclamps-f32 %v1211_v60, 1.0  ;;  %v1176_v57 = vmul.f32 %v1069_v36, %v2304_v30  ;;  %v1071_v63 = vmul.f32 %v1819_v44, %v2390_v32 }
 0x11f   : > { %v1823_v0 = vpop.eup %1822  ;;  %v1470_v4 = vmul.f32 2.0, %v1684_v21  ;;  %v1685_v46 = vclamps-f32 %v1249_v47, 1.0  ;;  %v1212_v5 = vadd.f32 0.5, %v1138_v22  ;;  %v1139_v6 = vmul.f32 %v995_v8, %v2307_v35  ;;  %v2459_v35 = vpop.f32.mrf.mxu1 }
 0x120   : > { %v1825_v24 = vpop.eup %1824  ;;  %1506 = vst [vmem:[%s2443_s9] sm:$0xff] %v1432_v55  ;;  %v1433_v9 = vmul.f32 2.0, %v1647_v14  ;;  %v1250_v49 = vadd.f32 0.5, %v1176_v57  ;;  %v1177_v10 = vmul.f32 %v1071_v63, %v2312_v38  ;;  %v997_v30 = vmul.f32 %v1821_v53, %v2393_v39  ;;  %v2467_v44 = vpop.f32.mrf.mxu0 }
 0x121   : > { %v1827_v17 = vpop.eup %1826  ;;  %1544 = vst [vmem:[%s2443_s9 + $0x130] sm:$0xff] %v1470_v4  ;;  %v1471_v32 = vmul.f32 2.0, %v1685_v46  ;;  %v1648_v23 = vclamps-f32 %v1212_v5, 1.0  ;;  %v1213_v15 = vadd.f32 0.5, %v1139_v6  ;;  %v1073_v25 = vmul.f32 %v1823_v0, %v2396_v45  ;;  %v2473_v57 = vpop.f32.mrf.mxu1 }
 0x122   : > { %v1829_v56 = vpop.eup %1828  ;;  %1507 = vst [vmem:[%s2443_s9 + $0x8] sm:$0xff] %v1433_v9  ;;  %v1686_v26 = vclamps-f32 %v1250_v49, 1.0  ;;  %v1251_v33 = vadd.f32 0.5, %v1177_v10  ;;  %v1140_v16 = vmul.f32 %v997_v30, %v2316_v42  ;;  %v999_v38 = vmul.f32 %v1825_v24, %v2399_v51 }
 0x123   : > { %v1831_v34 = vpop.eup %1830  ;;  %1545 = vst [vmem:[%s2443_s9 + $0x138] sm:$0xff] %v1471_v32  ;;  %v1434_v39 = vmul.f32 2.0, %v1648_v23  ;;  %v1649_v60 = vclamps-f32 %v1213_v15, 1.0  ;;  %v1178_v36 = vmul.f32 %v1073_v25, %v2319_v43  ;;  %v1075_v45 = vmul.f32 %v1827_v17, %v2402_v58 }
 0x124   : > { %v1833_v21 = vpop.eup %1832  ;;  %v1472_v47 = vmul.f32 2.0, %v1686_v26  ;;  %v1687_v22 = vclamps-f32 %v1251_v33, 1.0  ;;  %v1214_v8 = vadd.f32 0.5, %v1140_v16  ;;  %v1141_v42 = vmul.f32 %v999_v38, %v2325_v52 }
 0x125   : > { %v1835_v53 = vpop.eup %1834  ;;  %1508 = vst [vmem:[%s2443_s9 + $0x10] sm:$0xff] %v1434_v39  ;;  %v1435_v51 = vmul.f32 2.0, %v1649_v60  ;;  %v1252_v55 = vadd.f32 0.5, %v1178_v36  ;;  %v1179_v14 = vmul.f32 %v1075_v45, %v2328_v54  ;;  %v1001_v43 = vmul.f32 %v1829_v56, %v2405_v1  ;;  %v2480_v1 = vpop.f32.mrf.mxu0 }
 0x126   : > { %v1837_v58 = vpop.eup %1836  ;;  %1546 = vst [vmem:[%s2443_s9 + $0x140] sm:$0xff] %v1472_v47  ;;  %v1473_v63 = vmul.f32 2.0, %v1687_v22  ;;  %v1650_v0 = vclamps-f32 %v1214_v8, 1.0  ;;  %v1215_v4 = vadd.f32 0.5, %v1141_v42  ;;  %v1077_v46 = vmul.f32 %v1831_v34, %v2408_v7 }
 0x127   : > { %v1839_v5 = vpop.eup %1838  ;;  %1509 = vst [vmem:[%s2443_s9 + $0x18] sm:$0xff] %v1435_v51  ;;  %v1688_v52 = vclamps-f32 %v1252_v55, 1.0  ;;  %v1253_v6 = vadd.f32 0.5, %v1179_v14  ;;  %v1142_v24 = vmul.f32 %v1001_v43, %v2333_v61  ;;  %v1003_v54 = vmul.f32 %v1833_v21, %v2411_v20  ;;  %v2486_v61 = vpop.f32.mrf.mxu1 }
 0x128   : > { %v1841_v9 = vpop.eup %1840  ;;  %1547 = vst [vmem:[%s2443_s9 + $0x148] sm:$0xff] %v1473_v63  ;;  %v1436_v49 = vmul.f32 2.0, %v1650_v0  ;;  %v1651_v10 = vclamps-f32 %v1215_v4, 1.0  ;;  %v1180_v30 = vmul.f32 %v1077_v46, %v2336_v62  ;;  %v1079_v7 = vmul.f32 %v1835_v53, %v2414_v27  ;;  %v365_v38 = vpop.f32.mrf.mxu0 }
 0x129   : > { %v1474_v17 = vmul.f32 2.0, %v1688_v52  ;;  %v1689_v32 = vclamps-f32 %v1253_v6, 1.0  ;;  %v1216_v23 = vadd.f32 0.5, %v1142_v24  ;;  %v1143_v15 = vmul.f32 %v1003_v54, %v2339_v2  ;;  %v479_v21 = vpop.f32.mrf.mxu1 }
 0x12a   : > { %1510 = vst [vmem:[%s2443_s9 + $0x20] sm:$0xff] %v1436_v49  ;;  %v1437_v20 = vmul.f32 2.0, %v1651_v10  ;;  %v1254_v25 = vadd.f32 0.5, %v1180_v30  ;;  %v1181_v56 = vmul.f32 %v1079_v7, %v2342_v3  ;;  %v1005_v26 = vmul.f32 %v1837_v58, %v2417_v40  ;;  %v367_v53 = vpop.f32.mrf.mxu0 }
 0x12b   : > { %1548 = vst [vmem:[%s2443_s9 + $0x150] sm:$0xff] %v1474_v17  ;;  %v1475_v62 = vmul.f32 2.0, %v1689_v32  ;;  %v1652_v33 = vclamps-f32 %v1216_v23, 1.0  ;;  %v1217_v27 = vadd.f32 0.5, %v1143_v15  ;;  %v1081_v16 = vmul.f32 %v1839_v5, %v2421_v50  ;;  %v481_v58 = vpop.f32.mrf.mxu1 }
 0x12c   : > { %1511 = vst [vmem:[%s2443_s9 + $0x28] sm:$0xff] %v1437_v20  ;;  %v1690_v2 = vclamps-f32 %v1254_v25, 1.0  ;;  %v1255_v34 = vadd.f32 0.5, %v1181_v56  ;;  %v1144_v39 = vmul.f32 %v1005_v26, %v2349_v13  ;;  %v1007_v60 = vmul.f32 %v1841_v9, %v2425_v59  ;;  %v371_v52 = vpop.f32.mrf.mxu0 }
 0x12d   : > { %1549 = vst [vmem:[%s2443_s9 + $0x158] sm:$0xff] %v1475_v62  ;;  %v1438_v3 = vmul.f32 2.0, %v1652_v33  ;;  %v1653_v36 = vclamps-f32 %v1217_v27, 1.0  ;;  %v1182_v40 = vmul.f32 %v1081_v16, %v2352_v18  ;;  %v961_v45 = vadd.f32 2.0, %v2438_v41  ;;  %v485_v10 = vpop.f32.mrf.mxu1 }
 0x12e   : > { %v1476_v50 = vmul.f32 2.0, %v1690_v2  ;;  %v1691_v47 = vclamps-f32 %v1255_v34, 1.0  ;;  %v1218_v22 = vadd.f32 0.5, %v1144_v39  ;;  %v1145_v8 = vmul.f32 %v1007_v60, %v2357_v28 }
 0x12f   : > { %1512 = vst [vmem:[%s2443_s9 + $0x30] sm:$0xff] %v1438_v3  ;;  %v1439_v42 = vmul.f32 2.0, %v1653_v36  ;;  %v1256_v13 = vadd.f32 0.5, %v1182_v40  ;;  %1842 = vrcp.f32 %v961_v45  ;;  %v2503_v59 = vadd.f32 %v2447_v48, %v2280_v11  ;;  %v487_v27 = vpop.f32.mrf.mxu1 }
 0x130   : > { %1550 = vst [vmem:[%s2443_s9 + $0x160] sm:$0xff] %v1476_v50  ;;  %v1477_v18 = vmul.f32 2.0, %v1691_v47  ;;  %v1654_v51 = vclamps-f32 %v1218_v22, 1.0  ;;  %v1219_v55 = vadd.f32 0.5, %v1145_v8  ;;  %1844 = vpow2.f32 %v2384_v19 }
 0x131   : > { %1513 = vst [vmem:[%s2443_s9 + $0x38] sm:$0xff] %v1439_v42  ;;  %v1692_v14 = vclamps-f32 %v1256_v13, 1.0  ;;  %v592_v28 = vmin.f32 %v2503_v59, 20.0  ;;  %v2511_v43 = vadd.f32 %v2452_v29, %v2282_v12  ;;  %v2515_v48 = vadd.f32 %v2459_v35, %v2282_v12  ;;  %v491_v42 = vpop.f32.mrf.mxu1 }
 0x132   : > { %1551 = vst [vmem:[%s2443_s9 + $0x168] sm:$0xff] %v1477_v18  ;;  %v1440_v63 = vmul.f32 2.0, %v1654_v51  ;;  %v1655_v0 = vclamps-f32 %v1219_v55, 1.0  ;;  %v2520_v19 = vadd.f32 %v2467_v44, %v2280_v11  ;;  %v2524_v4 = vadd.f32 %v2473_v57, %v2280_v11 }
 0x133   : > { %v1478_v46 = vmul.f32 2.0, %v1692_v14  ;;  %v714_v29 = vmul.f32 1.442695, %v592_v28  ;;  %v555_v5 = vmin.f32 %v2511_v43, 20.0  ;;  %v593_v35 = vmin.f32 %v2515_v48, 20.0 }
 0x134   : > { %1514 = vst [vmem:[%s2443_s9 + $0x40] sm:$0xff] %v1440_v63  ;;  %v1441_v6 = vmul.f32 2.0, %v1655_v0  ;;  %v556_v24 = vmin.f32 %v2520_v19, 20.0  ;;  %v594_v54 = vmin.f32 %v2524_v4, 20.0  ;;  %v2533_v44 = vadd.f32 %v2480_v1, %v2282_v12 }
 0x135   : > { %1552 = vst [vmem:[%s2443_s9 + $0x170] sm:$0xff] %v1478_v46  ;;  %1846 = vpow2.f32 %v714_v29  ;;  %v640_v57 = vmul.f32 1.442695, %v555_v5  ;;  %v716_v9 = vmul.f32 1.442695, %v593_v35  ;;  %v2538_v49 = vadd.f32 %v2486_v61, %v2282_v12  ;;  %v373_v61 = vpop.f32.mrf.mxu0  ;;  %v493_v5 = vpop.f32.mrf.mxu1 }
 0x136   : > { %1515 = vst [vmem:[%s2443_s9 + $0x48] sm:$0xff] %v1441_v6  ;;  %v642_v30 = vmul.f32 1.442695, %v556_v24  ;;  %v718_v7 = vmul.f32 1.442695, %v594_v54  ;;  %v557_v17 = vmin.f32 %v2533_v44, 20.0  ;;  %v2543_v32 = vadd.f32 %v365_v38, %v2280_v11 }
 0x137   : > { %1848 = vpow2.f32 %v640_v57  ;;  %v595_v1 = vmin.f32 %v2538_v49, 20.0  ;;  %v2547_v23 = vadd.f32 %v479_v21, %v2280_v11  ;;  %v2550_v15 = vadd.f32 %v367_v53, %v2282_v12  ;;  %v377_v3 = vpop.f32.mrf.mxu0 }
 0x138   : > { %1850 = vpow2.f32 %v716_v9  ;;  %v644_v20 = vmul.f32 1.442695, %v557_v17  ;;  %v558_v25 = vmin.f32 %v2543_v32, 20.0  ;;  %v2554_v56 = vadd.f32 %v481_v58, %v2282_v12 }
 0x139   : > { %1852 = vpow2.f32 %v642_v30  ;;  %v720_v26 = vmul.f32 1.442695, %v595_v1  ;;  %v596_v62 = vmin.f32 %v2547_v23, 20.0  ;;  %v559_v33 = vmin.f32 %v2550_v15, 20.0  ;;  %v379_v28 = vpop.f32.mrf.mxu0 }
 0x13a   : > { %1854 = vpow2.f32 %v718_v7  ;;  %v646_v16 = vmul.f32 1.442695, %v558_v25  ;;  %v597_v38 = vmin.f32 %v2554_v56, 20.0  ;;  %v2560_v2 = vadd.f32 %v371_v52, %v2280_v11 }
 0x13b   : > { %1856 = vpow2.f32 %v644_v20  ;;  %v722_v34 = vmul.f32 1.442695, %v596_v62  ;;  %v648_v39 = vmul.f32 1.442695, %v559_v33  ;;  %v2563_v60 = vadd.f32 %v485_v10, %v2280_v11  ;;  %v383_v25 = vpop.f32.mrf.mxu0 }
 0x13c   : > { %v1843_v36 = vpop.eup %1842  ;;  %1858 = vpow2.f32 %v720_v26  ;;  %v724_v40 = vmul.f32 1.442695, %v597_v38  ;;  %v560_v45 = vmin.f32 %v2560_v2, 20.0  ;;  %v2567_v21 = vadd.f32 %v373_v61, %v2282_v12 }
 0x13d   : > { %v1845_v50 = vpop.eup %1844  ;;  %v1083_v47 = vmul.f32 %v1843_v36, %v2438_v41  ;;  %1860 = vpow2.f32 %v646_v16  ;;  %v598_v22 = vmin.f32 %v2563_v60, 20.0  ;;  %v2572_v8 = vadd.f32 %v487_v27, %v2282_v12 }
 0x13e   : > { %v776_v13 = vadd.f32 2.0, %v1845_v50  ;;  %1862 = vpow2.f32 %v722_v34  ;;  %v650_v53 = vmul.f32 1.442695, %v560_v45  ;;  %v561_v18 = vmin.f32 %v2567_v21, 20.0 }
 0x13f   : > { %v1183_v51 = vmul.f32 %v1083_v47, %v2360_v31  ;;  %1864 = vpow2.f32 %v648_v39  ;;  %v726_v55 = vmul.f32 1.442695, %v598_v22  ;;  %v599_v14 = vmin.f32 %v2572_v8, 20.0 }
 0x140   : > { %v2577_v41 = vmul.f32 %v1845_v50, %v776_v13  ;;  %1866 = vpow2.f32 %v724_v40  ;;  %v652_v58 = vmul.f32 1.442695, %v561_v18  ;;  %v2580_v63 = vadd.f32 %v377_v3, %v2280_v11 }
 0x141   : > { %v1257_v0 = vadd.f32 0.5, %v1183_v51  ;;  %1868 = vpow2.f32 %v650_v53  ;;  %v728_v46 = vmul.f32 1.442695, %v599_v14  ;;  %v2583_v29 = vadd.f32 %v491_v42, %v2280_v11 }
 0x142   : > { %v1847_v31 = vpop.eup %1846  ;;  %v924_v35 = vadd.f32 2.0, %v2577_v41  ;;  %1870 = vpow2.f32 %v726_v55  ;;  %v562_v52 = vmin.f32 %v2580_v63, 20.0  ;;  %v2588_v6 = vadd.f32 %v379_v28, %v2282_v12 }
 0x143   : > { %v1693_v24 = vclamps-f32 %v1257_v0, 1.0  ;;  %v814_v54 = vadd.f32 2.0, %v1847_v31  ;;  %1872 = vpow2.f32 %v652_v58  ;;  %v600_v57 = vmin.f32 %v2583_v29, 20.0 }
 0x144   : > { %v1849_v9 = vpop.eup %1848  ;;  %1874 = vrcp.f32 %v924_v35  ;;  %v654_v10 = vmul.f32 1.442695, %v562_v52  ;;  %v563_v30 = vmin.f32 %v2588_v6, 20.0  ;;  %v2593_v7 = vadd.f32 %v493_v5, %v2282_v12 }
 0x145   : > { %v1851_v17 = vpop.eup %1850  ;;  %v1479_v1 = vmul.f32 2.0, %v1693_v24  ;;  %v2595_v61 = vmul.f32 %v1847_v31, %v814_v54  ;;  %v777_v20 = vadd.f32 2.0, %v1849_v9  ;;  %1876 = vpow2.f32 %v728_v46 }
 0x146   : > { %v1853_v26 = vpop.eup %1852  ;;  %v815_v62 = vadd.f32 2.0, %v1851_v17  ;;  %1878 = vpow2.f32 %v654_v10  ;;  %v730_v33 = vmul.f32 1.442695, %v600_v57  ;;  %v656_v27 = vmul.f32 1.442695, %v563_v30 }
 0x147   : > { %v1855_v16 = vpop.eup %1854  ;;  %1553 = vst [vmem:[%s2443_s9 + $0x178] sm:$0xff] %v1479_v1  ;;  %v962_v38 = vadd.f32 2.0, %v2595_v61  ;;  %v2599_v34 = vmul.f32 %v1849_v9, %v777_v20  ;;  %v778_v39 = vadd.f32 2.0, %v1853_v26  ;;  %v601_v3 = vmin.f32 %v2593_v7, 20.0 }
 0x148   : > { %v1857_v36 = vpop.eup %1856  ;;  %v2602_v40 = vmul.f32 %v1851_v17, %v815_v62  ;;  %v816_v45 = vadd.f32 2.0, %v1855_v16  ;;  %1880 = vpow2.f32 %v730_v33  ;;  %v2605_v50 = vadd.f32 %v383_v25, %v2280_v11 }
 0x149   : > { %v1859_v47 = vpop.eup %1858  ;;  %1882 = vrcp.f32 %v962_v38  ;;  %v925_v22 = vadd.f32 2.0, %v2599_v34  ;;  %v2608_v42 = vmul.f32 %v1853_v26, %v778_v39  ;;  %v779_v13 = vadd.f32 2.0, %v1857_v36 }
 0x14a   : > { %v1861_v53 = vpop.eup %1860  ;;  %v963_v18 = vadd.f32 2.0, %v2602_v40  ;;  %v2611_v51 = vmul.f32 %v1855_v16, %v816_v45  ;;  %v817_v55 = vadd.f32 2.0, %v1859_v47  ;;  %1884 = vpow2.f32 %v656_v27 }
 0x14b   : > { %v1863_v14 = vpop.eup %1862  ;;  %1886 = vrcp.f32 %v925_v22  ;;  %v926_v28 = vadd.f32 2.0, %v2608_v42  ;;  %v2614_v58 = vmul.f32 %v1857_v36, %v779_v13  ;;  %v780_v0 = vadd.f32 2.0, %v1861_v53 }
 0x14c   : > { %v1865_v46 = vpop.eup %1864  ;;  %1888 = vrcp.f32 %v963_v18  ;;  %v964_v5 = vadd.f32 2.0, %v2611_v51  ;;  %v2617_v31 = vmul.f32 %v1859_v47, %v817_v55  ;;  %v818_v35 = vadd.f32 2.0, %v1863_v14 }
 0x14d   : > { %v1867_v52 = vpop.eup %1866  ;;  %1890 = vrcp.f32 %v926_v28  ;;  %v927_v24 = vadd.f32 2.0, %v2614_v58  ;;  %v2620_v54 = vmul.f32 %v1861_v53, %v780_v0  ;;  %v781_v57 = vadd.f32 2.0, %v1865_v46 }
 0x14e   : > { %v1869_v9 = vpop.eup %1868  ;;  %1892 = vrcp.f32 %v964_v5  ;;  %v965_v10 = vadd.f32 2.0, %v2617_v31  ;;  %v2623_v30 = vmul.f32 %v1863_v14, %v818_v35  ;;  %v819_v17 = vadd.f32 2.0, %v1867_v52 }
 0x14f   : > { %v1871_v1 = vpop.eup %1870  ;;  %1894 = vrcp.f32 %v927_v24  ;;  %v928_v20 = vadd.f32 2.0, %v2620_v54  ;;  %v2626_v25 = vmul.f32 %v1865_v46, %v781_v57  ;;  %v782_v26 = vadd.f32 2.0, %v1869_v9 }
 0x150   : > { %v1873_v62 = vpop.eup %1872  ;;  %1896 = vrcp.f32 %v965_v10  ;;  %v966_v33 = vadd.f32 2.0, %v2623_v30  ;;  %v2629_v27 = vmul.f32 %v1867_v52, %v819_v17  ;;  %v820_v16 = vadd.f32 2.0, %v1871_v1 }
 0x151   : > { %v1875_v38 = vpop.eup %1874  ;;  %1898 = vrcp.f32 %v928_v20  ;;  %v929_v39 = vadd.f32 2.0, %v2626_v25  ;;  %v2632_v36 = vmul.f32 %v1869_v9, %v782_v26  ;;  %v783_v45 = vadd.f32 2.0, %v1873_v62 }
 0x152   : > { %v1877_v47 = vpop.eup %1876  ;;  %v1009_v22 = vmul.f32 %v1875_v38, %v2577_v41  ;;  %1900 = vrcp.f32 %v966_v33  ;;  %v967_v13 = vadd.f32 2.0, %v2629_v27  ;;  %v2636_v53 = vmul.f32 %v1871_v1, %v820_v16 }
 0x153   : > { %v1879_v18 = vpop.eup %1878  ;;  %1902 = vrcp.f32 %v929_v39  ;;  %v930_v55 = vadd.f32 2.0, %v2632_v36  ;;  %v2639_v14 = vmul.f32 %v1873_v62, %v783_v45  ;;  %v821_v28 = vadd.f32 2.0, %v1877_v47 }
 0x154   : > { %v1146_v0 = vmul.f32 %v1009_v22, %v2363_v37  ;;  %1904 = vrcp.f32 %v967_v13  ;;  %v968_v46 = vadd.f32 2.0, %v2636_v53  ;;  %v784_v5 = vadd.f32 2.0, %v1879_v18  ;;  %v497_v22 = vpop.f32.mrf.mxu1 }
 0x155   : > { %v1881_v35 = vpop.eup %1880  ;;  %1906 = vrcp.f32 %v930_v55  ;;  %v931_v41 = vadd.f32 2.0, %v2639_v14  ;;  %v2644_v52 = vmul.f32 %v1877_v47, %v821_v28  ;;  %v2648_v24 = vmul.f32 1.442695, %v601_v3 }
 0x156   : > { %v1883_v57 = vpop.eup %1882  ;;  %v1220_v9 = vadd.f32 0.5, %v1146_v0  ;;  %1908 = vrcp.f32 %v968_v46  ;;  %v2650_v10 = vmul.f32 %v1879_v18, %v784_v5  ;;  %v822_v37 = vadd.f32 2.0, %v1881_v35 }
 0x157   : > { %v1885_v17 = vpop.eup %1884  ;;  %v1085_v1 = vmul.f32 %v1883_v57, %v2595_v61  ;;  %1910 = vrcp.f32 %v931_v41  ;;  %v969_v20 = vadd.f32 2.0, %v2644_v52  ;;  %v564_v26 = vmin.f32 %v2605_v50, 20.0 }
 0x158   : > { %v1887_v62 = vpop.eup %1886  ;;  %v1656_v33 = vclamps-f32 %v1220_v9, 1.0  ;;  %v932_v16 = vadd.f32 2.0, %v2650_v10  ;;  %v2656_v3 = vmul.f32 %v1881_v35, %v822_v37  ;;  %v785_v38 = vadd.f32 2.0, %v1885_v17 }
 0x159   : > { %v1889_v39 = vpop.eup %1888  ;;  %v1184_v45 = vmul.f32 %v1085_v1, %v2503_v59  ;;  %v1011_v47 = vmul.f32 %v1887_v62, %v2599_v34  ;;  %1912 = vrcp.f32 %v969_v20  ;;  %v2660_v61 = vmul.f32 1.442695, %v564_v26 }
 0x15a   : > { %v1891_v13 = vpop.eup %1890  ;;  %v1442_v18 = vmul.f32 2.0, %v1656_v33  ;;  %v1087_v55 = vmul.f32 %v1889_v39, %v2602_v40  ;;  %1914 = vrcp.f32 %v932_v16  ;;  %v970_v28 = vadd.f32 2.0, %v2656_v3 }
 0x15b   : > { %v1893_v0 = vpop.eup %1892  ;;  %v1258_v46 = vadd.f32 0.5, %v1184_v45  ;;  %v1147_v5 = vmul.f32 %v1011_v47, %v2511_v43  ;;  %v1013_v59 = vmul.f32 %v1891_v13, %v2608_v42  ;;  %v2666_v35 = vmul.f32 %v1885_v17, %v785_v38 }
 0x15c   : > { %v1895_v34 = vpop.eup %1894  ;;  %1516 = vst [vmem:[%s2443_s9 + $0x50] sm:$0xff] %v1442_v18  ;;  %v1185_v41 = vmul.f32 %v1087_v55, %v2515_v48  ;;  %v1089_v57 = vmul.f32 %v1893_v0, %v2611_v51  ;;  %1916 = vrcp.f32 %v970_v28  ;;  %v2672_v40 = vadd.f32 %v497_v22, %v2280_v11 }
 0x15d   : > { %v1897_v9 = vpop.eup %1896  ;;  %v1694_v37 = vclamps-f32 %v1258_v46, 1.0  ;;  %v1221_v1 = vadd.f32 0.5, %v1147_v5  ;;  %v1148_v20 = vmul.f32 %v1013_v59, %v2520_v19  ;;  %v1015_v43 = vmul.f32 %v1895_v34, %v2614_v58 }
 0x15e   : > { %v1899_v42 = vpop.eup %1898  ;;  %v1259_v17 = vadd.f32 0.5, %v1185_v41  ;;  %v1186_v26 = vmul.f32 %v1089_v57, %v2524_v4  ;;  %v1091_v48 = vmul.f32 %v1897_v9, %v2617_v31  ;;  %v2679_v51 = vadd.f32 2.0, %v2666_v35  ;;  %v2684_v4 = vpop.f32.mrf.mxu0 }
 0x15f   : > { %v1901_v62 = vpop.eup %1900  ;;  %v1480_v33 = vmul.f32 2.0, %v1694_v37  ;;  %v1657_v16 = vclamps-f32 %v1221_v1, 1.0  ;;  %v1222_v38 = vadd.f32 0.5, %v1148_v20  ;;  %v1149_v39 = vmul.f32 %v1015_v43, %v2533_v44  ;;  %v2692_v9 = vpop.f32.mrf.mxu1 }
 0x160   : > { %v1903_v45 = vpop.eup %1902  ;;  %v1695_v19 = vclamps-f32 %v1259_v17, 1.0  ;;  %v1260_v47 = vadd.f32 0.5, %v1186_v26  ;;  %v1187_v58 = vmul.f32 %v1091_v48, %v2538_v49  ;;  %v1017_v22 = vmul.f32 %v1899_v42, %v2620_v54 }
 0x161   : > { %v1905_v31 = vpop.eup %1904  ;;  %1554 = vst [vmem:[%s2443_s9 + $0x180] sm:$0xff] %v1480_v33  ;;  %v1443_v13 = vmul.f32 2.0, %v1657_v16  ;;  %v1658_v18 = vclamps-f32 %v1222_v38, 1.0  ;;  %v1223_v55 = vadd.f32 0.5, %v1149_v39  ;;  %v1093_v28 = vmul.f32 %v1901_v62, %v2623_v30 }
 0x162   : > { %v1907_v0 = vpop.eup %1906  ;;  %v1481_v44 = vmul.f32 2.0, %v1695_v19  ;;  %v1696_v46 = vclamps-f32 %v1260_v47, 1.0  ;;  %v1261_v5 = vadd.f32 0.5, %v1187_v58  ;;  %v1150_v59 = vmul.f32 %v1017_v22, %v2543_v32  ;;  %v2696_v32 = vpop.f32.mrf.mxu0 }
 0x163   : > { %v1909_v49 = vpop.eup %1908  ;;  %1517 = vst [vmem:[%s2443_s9 + $0x58] sm:$0xff] %v1443_v13  ;;  %v1444_v54 = vmul.f32 2.0, %v1658_v18  ;;  %v1659_v34 = vclamps-f32 %v1223_v55, 1.0  ;;  %v1188_v41 = vmul.f32 %v1093_v28, %v2547_v23  ;;  %v1019_v57 = vmul.f32 %v1903_v45, %v2626_v25 }
 0x164   : > { %v1911_v37 = vpop.eup %1910  ;;  %1555 = vst [vmem:[%s2443_s9 + $0x188] sm:$0xff] %v1481_v44  ;;  %v1482_v30 = vmul.f32 2.0, %v1696_v46  ;;  %v1697_v1 = vclamps-f32 %v1261_v5, 1.0  ;;  %v1224_v20 = vadd.f32 0.5, %v1150_v59  ;;  %v1095_v43 = vmul.f32 %v1905_v31, %v2629_v27  ;;  %v391_v22 = vpop.f32.mrf.mxu0 }
 0x165   : > { %1518 = vst [vmem:[%s2443_s9 + $0x60] sm:$0xff] %v1444_v54  ;;  %v1445_v42 = vmul.f32 2.0, %v1659_v34  ;;  %v1262_v17 = vadd.f32 0.5, %v1188_v41  ;;  %v1151_v23 = vmul.f32 %v1019_v57, %v2550_v15  ;;  %v1021_v25 = vmul.f32 %v1907_v0, %v2632_v36  ;;  %v503_v15 = vpop.f32.mrf.mxu1 }
 0x166   : > { %v1913_v26 = vpop.eup %1912  ;;  %1556 = vst [vmem:[%s2443_s9 + $0x190] sm:$0xff] %v1482_v30  ;;  %v1483_v48 = vmul.f32 2.0, %v1697_v1  ;;  %v1660_v62 = vclamps-f32 %v1224_v20, 1.0  ;;  %v1189_v33 = vmul.f32 %v1095_v43, %v2554_v56  ;;  %v1097_v16 = vmul.f32 %v1909_v49, %v2636_v53  ;;  %v395_v34 = vpop.f32.mrf.mxu0 }
 0x167   : > { %v1915_v38 = vpop.eup %1914  ;;  %1519 = vst [vmem:[%s2443_s9 + $0x68] sm:$0xff] %v1445_v42  ;;  %v1698_v27 = vclamps-f32 %v1262_v17, 1.0  ;;  %v1225_v39 = vadd.f32 0.5, %v1151_v23  ;;  %v1152_v45 = vmul.f32 %v1021_v25, %v2560_v2  ;;  %v1023_v19 = vmul.f32 %v1911_v37, %v2639_v14  ;;  %v505_v5 = vpop.f32.mrf.mxu1 }
 0x168   : > { %1557 = vst [vmem:[%s2443_s9 + $0x198] sm:$0xff] %v1483_v48  ;;  %v1446_v36 = vmul.f32 2.0, %v1660_v62  ;;  %v1263_v47 = vadd.f32 0.5, %v1189_v33  ;;  %v1190_v58 = vmul.f32 %v1097_v16, %v2563_v60  ;;  %v1099_v56 = vmul.f32 %v1913_v26, %v2644_v52 }
 0x169   : > { %v1917_v53 = vpop.eup %1916  ;;  %v1484_v31 = vmul.f32 2.0, %v1698_v27  ;;  %v1661_v13 = vclamps-f32 %v1225_v39, 1.0  ;;  %v1226_v18 = vadd.f32 0.5, %v1152_v45  ;;  %v1153_v55 = vmul.f32 %v1023_v19, %v2567_v21  ;;  %v509_v20 = vpop.f32.mrf.mxu1 }
 0x16a   : > { %1520 = vst [vmem:[%s2443_s9 + $0x70] sm:$0xff] %v1446_v36  ;;  %v1699_v2 = vclamps-f32 %v1263_v47, 1.0  ;;  %v1264_v14 = vadd.f32 0.5, %v1190_v58  ;;  %v1191_v28 = vmul.f32 %v1099_v56, %v2572_v8  ;;  %v1025_v0 = vmul.f32 %v1915_v38, %v2650_v10 }
 0x16b   : > { %1558 = vst [vmem:[%s2443_s9 + $0x1a0] sm:$0xff] %v1484_v31  ;;  %v1447_v60 = vmul.f32 2.0, %v1661_v13  ;;  %v1662_v44 = vclamps-f32 %v1226_v18, 1.0  ;;  %v1227_v52 = vadd.f32 0.5, %v1153_v55  ;;  %v1101_v46 = vmul.f32 %v1917_v53, %v2656_v3  ;;  %v511_v16 = vpop.f32.mrf.mxu1 }
 0x16c   : > { %v1485_v59 = vmul.f32 2.0, %v1699_v2  ;;  %v1700_v49 = vclamps-f32 %v1264_v14, 1.0  ;;  %v1265_v21 = vadd.f32 0.5, %v1191_v28  ;;  %v1154_v54 = vmul.f32 %v1025_v0, %v2580_v63 }
 0x16d   : > { %1521 = vst [vmem:[%s2443_s9 + $0x78] sm:$0xff] %v1447_v60  ;;  %v1448_v8 = vmul.f32 2.0, %v1662_v44  ;;  %v1663_v41 = vclamps-f32 %v1227_v52, 1.0  ;;  %v1192_v10 = vmul.f32 %v1101_v46, %v2583_v29  ;;  %1918 = vrcp.f32 %v2679_v51  ;;  %v515_v55 = vpop.f32.mrf.mxu1 }
 0x16e   : > { %1559 = vst [vmem:[%s2443_s9 + $0x1a8] sm:$0xff] %v1485_v59  ;;  %v1486_v57 = vmul.f32 2.0, %v1700_v49  ;;  %v1701_v3 = vclamps-f32 %v1265_v21, 1.0  ;;  %v1228_v37 = vadd.f32 0.5, %v1154_v54  ;;  %1920 = vpow2.f32 %v2648_v24  ;;  %v397_v24 = vpop.f32.mrf.mxu0 }
 0x16f   : > { %1522 = vst [vmem:[%s2443_s9 + $0x80] sm:$0xff] %v1448_v8  ;;  %v1449_v30 = vmul.f32 2.0, %v1663_v41  ;;  %v1266_v63 = vadd.f32 0.5, %v1192_v10  ;;  %1922 = vpow2.f32 %v2660_v61  ;;  %v602_v1 = vmin.f32 %v2672_v40, 20.0  ;;  %v517_v41 = vpop.f32.mrf.mxu1 }
 0x170   : > { %1560 = vst [vmem:[%s2443_s9 + $0x1b0] sm:$0xff] %v1486_v57  ;;  %v1487_v29 = vmul.f32 2.0, %v1701_v3  ;;  %v1664_v43 = vclamps-f32 %v1228_v37, 1.0  ;;  %v2728_v51 = vadd.f32 %v2684_v4, %v2282_v12  ;;  %v2732_v42 = vadd.f32 %v2692_v9, %v2282_v12  ;;  %v401_v19 = vpop.f32.mrf.mxu0 }
 0x171   : > { %1523 = vst [vmem:[%s2443_s9 + $0x88] sm:$0xff] %v1449_v30  ;;  %v1702_v17 = vclamps-f32 %v1266_v63, 1.0  ;;  %v734_v23 = vmul.f32 1.442695, %v602_v1  ;;  %v2737_v61 = vadd.f32 %v2696_v32, %v2280_v11  ;;  %v2740_v25 = vadd.f32 %v503_v15, %v2280_v11 }
 0x172   : > { %1561 = vst [vmem:[%s2443_s9 + $0x1b8] sm:$0xff] %v1487_v29  ;;  %v1450_v4 = vmul.f32 2.0, %v1664_v43  ;;  %v565_v26 = vmin.f32 %v2728_v51, 20.0  ;;  %v603_v9 = vmin.f32 %v2732_v42, 20.0  ;;  %v2746_v48 = vadd.f32 %v391_v22, %v2282_v12  ;;  %v403_v0 = vpop.f32.mrf.mxu0 }
 0x173   : > { %v1488_v62 = vmul.f32 2.0, %v1702_v17  ;;  %1924 = vpow2.f32 %v734_v23  ;;  %v566_v33 = vmin.f32 %v2737_v61, 20.0  ;;  %v604_v32 = vmin.f32 %v2740_v25, 20.0 }
 0x174   : > { %1524 = vst [vmem:[%s2443_s9 + $0x90] sm:$0xff] %v1450_v4  ;;  %v660_v38 = vmul.f32 1.442695, %v565_v26  ;;  %v736_v27 = vmul.f32 1.442695, %v603_v9  ;;  %v567_v39 = vmin.f32 %v2746_v48, 20.0  ;;  %v2753_v45 = vadd.f32 %v505_v5, %v2282_v12  ;;  %v407_v30 = vpop.f32.mrf.mxu0  ;;  %v521_v4 = vpop.f32.mrf.mxu1 }
 0x175   : > { %1562 = vst [vmem:[%s2443_s9 + $0x1c0] sm:$0xff] %v1488_v62  ;;  %v662_v15 = vmul.f32 1.442695, %v566_v33  ;;  %v738_v36 = vmul.f32 1.442695, %v604_v32  ;;  %v2757_v47 = vadd.f32 %v395_v34, %v2280_v11  ;;  %v2760_v58 = vadd.f32 %v509_v20, %v2280_v11 }
 0x176   : > { %1926 = vpow2.f32 %v660_v38  ;;  %v664_v56 = vmul.f32 1.442695, %v567_v39  ;;  %v605_v22 = vmin.f32 %v2753_v45, 20.0  ;;  %v2764_v53 = vadd.f32 %v397_v24, %v2282_v12  ;;  %v409_v33 = vpop.f32.mrf.mxu0 }
 0x177   : > { %1928 = vpow2.f32 %v736_v27  ;;  %v568_v31 = vmin.f32 %v2757_v47, 20.0  ;;  %v606_v13 = vmin.f32 %v2760_v58, 20.0  ;;  %v2769_v18 = vadd.f32 %v511_v16, %v2282_v12 }
 0x178   : > { %1930 = vpow2.f32 %v662_v15  ;;  %v740_v2 = vmul.f32 1.442695, %v605_v22  ;;  %v569_v14 = vmin.f32 %v2764_v53, 20.0  ;;  %v2773_v28 = vadd.f32 %v401_v19, %v2280_v11 }
 0x179   : > { %1932 = vpow2.f32 %v738_v36  ;;  %v666_v60 = vmul.f32 1.442695, %v568_v31  ;;  %v742_v44 = vmul.f32 1.442695, %v606_v13  ;;  %v607_v52 = vmin.f32 %v2769_v18, 20.0 }
 0x17a   : > { %v1919_v46 = vpop.eup %1918  ;;  %1934 = vpow2.f32 %v664_v56  ;;  %v668_v5 = vmul.f32 1.442695, %v569_v14  ;;  %v570_v59 = vmin.f32 %v2773_v28, 20.0  ;;  %v2778_v49 = vadd.f32 %v515_v55, %v2280_v11 }
 0x17b   : > { %v1921_v21 = vpop.eup %1920  ;;  %v1027_v54 = vmul.f32 %v1919_v46, %v2666_v35  ;;  %1936 = vpow2.f32 %v740_v2  ;;  %v744_v34 = vmul.f32 1.442695, %v607_v52  ;;  %v2782_v8 = vadd.f32 %v403_v0, %v2282_v12 }
 0x17c   : > { %v1923_v10 = vpop.eup %1922  ;;  %v823_v57 = vadd.f32 2.0, %v1921_v21  ;;  %1938 = vpow2.f32 %v666_v60  ;;  %v670_v3 = vmul.f32 1.442695, %v570_v59  ;;  %v608_v37 = vmin.f32 %v2778_v49, 20.0 }
 0x17d   : > { %v1155_v63 = vmul.f32 %v1027_v54, %v2588_v6  ;;  %v786_v1 = vadd.f32 2.0, %v1923_v10  ;;  %1940 = vpow2.f32 %v742_v44  ;;  %v571_v20 = vmin.f32 %v2782_v8, 20.0 }
 0x17e   : > { %v2787_v35 = vmul.f32 %v1921_v21, %v823_v57  ;;  %1942 = vpow2.f32 %v668_v5  ;;  %v746_v29 = vmul.f32 1.442695, %v608_v37  ;;  %v2790_v43 = vadd.f32 %v517_v41, %v2282_v12 }
 0x17f   : > { %v1229_v24 = vadd.f32 0.5, %v1155_v63  ;;  %v2792_v17 = vmul.f32 %v1923_v10, %v786_v1  ;;  %1944 = vpow2.f32 %v744_v34  ;;  %v672_v23 = vmul.f32 1.442695, %v571_v20 }
 0x180   : > { %v1925_v26 = vpop.eup %1924  ;;  %v971_v6 = vadd.f32 2.0, %v2787_v35  ;;  %1946 = vpow2.f32 %v670_v3  ;;  %v609_v9 = vmin.f32 %v2790_v43, 20.0  ;;  %v2797_v62 = vadd.f32 %v407_v30, %v2280_v11 }
 0x181   : > { %v1665_v32 = vclamps-f32 %v1229_v24, 1.0  ;;  %v934_v16 = vadd.f32 2.0, %v2792_v17  ;;  %v824_v38 = vadd.f32 2.0, %v1925_v26  ;;  %1948 = vpow2.f32 %v746_v29 }
 0x182   : > { %1950 = vrcp.f32 %v971_v6  ;;  %v748_v27 = vmul.f32 1.442695, %v609_v9  ;;  %v572_v39 = vmin.f32 %v2797_v62, 20.0  ;;  %v2802_v19 = vadd.f32 %v521_v4, %v2280_v11 }
 0x183   : > { %v1927_v15 = vpop.eup %1926  ;;  %v1451_v36 = vmul.f32 2.0, %v1665_v32  ;;  %1952 = vrcp.f32 %v934_v16  ;;  %v2804_v56 = vmul.f32 %v1925_v26, %v824_v38  ;;  %v2807_v22 = vadd.f32 %v409_v33, %v2282_v12 }
 0x184   : > { %v1929_v31 = vpop.eup %1928  ;;  %v787_v13 = vadd.f32 2.0, %v1927_v15  ;;  %1954 = vpow2.f32 %v672_v23  ;;  %v674_v55 = vmul.f32 1.442695, %v572_v39  ;;  %v610_v2 = vmin.f32 %v2802_v19, 20.0 }
 0x185   : > { %v1931_v14 = vpop.eup %1930  ;;  %1525 = vst [vmem:[%s2443_s9 + $0x98] sm:$0xff] %v1451_v36  ;;  %v972_v0 = vadd.f32 2.0, %v2804_v56  ;;  %v825_v60 = vadd.f32 2.0, %v1929_v31  ;;  %1956 = vpow2.f32 %v748_v27  ;;  %v573_v44 = vmin.f32 %v2807_v22, 20.0 }
 0x186   : > { %v1933_v52 = vpop.eup %1932  ;;  %v2813_v46 = vmul.f32 %v1927_v15, %v787_v13  ;;  %v788_v5 = vadd.f32 2.0, %v1931_v14  ;;  %1958 = vpow2.f32 %v674_v55  ;;  %v750_v59 = vmul.f32 1.442695, %v610_v2 }
 0x187   : > { %v1935_v21 = vpop.eup %1934  ;;  %1960 = vrcp.f32 %v972_v0  ;;  %v2815_v54 = vmul.f32 %v1929_v31, %v825_v60  ;;  %v826_v34 = vadd.f32 2.0, %v1933_v52  ;;  %v676_v41 = vmul.f32 1.442695, %v573_v44 }
 0x188   : > { %v1937_v10 = vpop.eup %1936  ;;  %v935_v57 = vadd.f32 2.0, %v2813_v46  ;;  %v2818_v3 = vmul.f32 %v1931_v14, %v788_v5  ;;  %v789_v37 = vadd.f32 2.0, %v1935_v21  ;;  %1962 = vpow2.f32 %v750_v59 }
 0x189   : > { %v1939_v30 = vpop.eup %1938  ;;  %v973_v63 = vadd.f32 2.0, %v2815_v54  ;;  %v2821_v1 = vmul.f32 %v1933_v52, %v826_v34  ;;  %v827_v20 = vadd.f32 2.0, %v1937_v10  ;;  %1964 = vpow2.f32 %v676_v41 }
 0x18a   : > { %v1941_v29 = vpop.eup %1940  ;;  %1966 = vrcp.f32 %v935_v57  ;;  %v936_v24 = vadd.f32 2.0, %v2818_v3  ;;  %v2824_v23 = vmul.f32 %v1935_v21, %v789_v37  ;;  %v790_v4 = vadd.f32 2.0, %v1939_v30 }
 0x18b   : > { %v1943_v26 = vpop.eup %1942  ;;  %1968 = vrcp.f32 %v973_v63  ;;  %v974_v6 = vadd.f32 2.0, %v2821_v1  ;;  %v2827_v9 = vmul.f32 %v1937_v10, %v827_v20  ;;  %v828_v33 = vadd.f32 2.0, %v1941_v29 }
 0x18c   : > { %v1945_v32 = vpop.eup %1944  ;;  %1970 = vrcp.f32 %v936_v24  ;;  %v937_v16 = vadd.f32 2.0, %v2824_v23  ;;  %v2830_v38 = vmul.f32 %v1939_v30, %v790_v4  ;;  %v791_v27 = vadd.f32 2.0, %v1943_v26 }
 0x18d   : > { %v1947_v39 = vpop.eup %1946  ;;  %1972 = vrcp.f32 %v974_v6  ;;  %v975_v15 = vadd.f32 2.0, %v2827_v9  ;;  %v2833_v36 = vmul.f32 %v1941_v29, %v828_v33  ;;  %v829_v31 = vadd.f32 2.0, %v1945_v32 }
 0x18e   : > { %v1949_v13 = vpop.eup %1948  ;;  %1974 = vrcp.f32 %v937_v16  ;;  %v938_v55 = vadd.f32 2.0, %v2830_v38  ;;  %v2836_v2 = vmul.f32 %v1943_v26, %v791_v27  ;;  %v792_v14 = vadd.f32 2.0, %v1947_v39 }
 0x18f   : > { %v1951_v0 = vpop.eup %1950  ;;  %1976 = vrcp.f32 %v975_v15  ;;  %v976_v60 = vadd.f32 2.0, %v2833_v36  ;;  %v2839_v44 = vmul.f32 %v1945_v32, %v829_v31  ;;  %v830_v52 = vadd.f32 2.0, %v1949_v13 }
 0x190   : > { %v1953_v5 = vpop.eup %1952  ;;  %v1103_v59 = vmul.f32 %v1951_v0, %v2787_v35  ;;  %1978 = vrcp.f32 %v938_v55  ;;  %v939_v21 = vadd.f32 2.0, %v2836_v2  ;;  %v2843_v34 = vmul.f32 %v1947_v39, %v792_v14 }
 0x191   : > { %v1955_v41 = vpop.eup %1954  ;;  %v1029_v10 = vmul.f32 %v1953_v5, %v2792_v17  ;;  %1980 = vrcp.f32 %v976_v60  ;;  %v977_v57 = vadd.f32 2.0, %v2839_v44  ;;  %v2847_v37 = vmul.f32 %v1949_v13, %v830_v52 }
 0x192   : > { %v1957_v30 = vpop.eup %1956  ;;  %v1193_v63 = vmul.f32 %v1103_v59, %v2593_v7  ;;  %1982 = vrcp.f32 %v939_v21  ;;  %v940_v20 = vadd.f32 2.0, %v2843_v34  ;;  %v793_v35 = vadd.f32 2.0, %v1955_v41 }
 0x193   : > { %v1959_v29 = vpop.eup %1958  ;;  %v1156_v24 = vmul.f32 %v1029_v10, %v2605_v50  ;;  %1984 = vrcp.f32 %v977_v57  ;;  %v978_v4 = vadd.f32 2.0, %v2847_v37  ;;  %v831_v26 = vadd.f32 2.0, %v1957_v30 }
 0x194   : > { %v1961_v17 = vpop.eup %1960  ;;  %v1267_v6 = vadd.f32 0.5, %v1193_v63  ;;  %1986 = vrcp.f32 %v940_v20  ;;  %v2853_v33 = vmul.f32 %v1955_v41, %v793_v35  ;;  %v794_v32 = vadd.f32 2.0, %v1959_v29 }
 0x195   : > { %v1963_v16 = vpop.eup %1962  ;;  %v1230_v27 = vadd.f32 0.5, %v1156_v24  ;;  %v1105_v7 = vmul.f32 %v1961_v17, %v2804_v56  ;;  %1988 = vrcp.f32 %v978_v4  ;;  %v2856_v39 = vmul.f32 %v1957_v30, %v831_v26 }
 0x196   : > { %v1965_v15 = vpop.eup %1964  ;;  %v1703_v31 = vclamps-f32 %v1267_v6, 1.0  ;;  %v941_v50 = vadd.f32 2.0, %v2853_v33  ;;  %v2859_v13 = vmul.f32 %v1959_v29, %v794_v32  ;;  %v832_v55 = vadd.f32 2.0, %v1963_v16 }
 0x197   : > { %v1967_v14 = vpop.eup %1966  ;;  %v1666_v0 = vclamps-f32 %v1230_v27, 1.0  ;;  %v1194_v60 = vmul.f32 %v1105_v7, %v2672_v40  ;;  %v979_v52 = vadd.f32 2.0, %v2856_v39  ;;  %v795_v5 = vadd.f32 2.0, %v1965_v15 }
 0x198   : > { %v1969_v59 = vpop.eup %1968  ;;  %v1489_v56 = vmul.f32 2.0, %v1703_v31  ;;  %v1031_v21 = vmul.f32 %v1967_v14, %v2813_v46  ;;  %1990 = vrcp.f32 %v941_v50  ;;  %v942_v41 = vadd.f32 2.0, %v2859_v13 }
 0x199   : > { %v1971_v10 = vpop.eup %1970  ;;  %v1452_v57 = vmul.f32 2.0, %v1666_v0  ;;  %v1268_v30 = vadd.f32 0.5, %v1194_v60  ;;  %v1107_v63 = vmul.f32 %v1969_v59, %v2815_v54  ;;  %1992 = vrcp.f32 %v979_v52 }
 0x19a   : > { %v1973_v20 = vpop.eup %1972  ;;  %1563 = vst [vmem:[%s2443_s9 + $0x1c8] sm:$0xff] %v1489_v56  ;;  %v1157_v40 = vmul.f32 %v1031_v21, %v2728_v51  ;;  %v1033_v35 = vmul.f32 %v1971_v10, %v2818_v3  ;;  %1994 = vrcp.f32 %v942_v41  ;;  %v2869_v29 = vmul.f32 %v1963_v16, %v832_v55  ;;  %v2881_v16 = vpop.f32.mrf.mxu0 }
 0x19b   : > { %v1975_v24 = vpop.eup %1974  ;;  %1526 = vst [vmem:[%s2443_s9 + $0xa0] sm:$0xff] %v1452_v57  ;;  %v1704_v46 = vclamps-f32 %v1268_v30, 1.0  ;;  %v1195_v4 = vmul.f32 %v1107_v63, %v2732_v42  ;;  %v1109_v26 = vmul.f32 %v1973_v20, %v2821_v1  ;;  %v2874_v17 = vmul.f32 %v1965_v15, %v795_v5  ;;  %v2885_v15 = vpop.f32.mrf.mxu1 }
 0x19c   : > { %v1977_v54 = vpop.eup %1976  ;;  %v1231_v6 = vadd.f32 0.5, %v1157_v40  ;;  %v1158_v32 = vmul.f32 %v1033_v35, %v2737_v61  ;;  %v1035_v51 = vmul.f32 %v1975_v24, %v2824_v23  ;;  %v2879_v3 = vadd.f32 2.0, %v2869_v29  ;;  %v2893_v10 = vpop.f32.mrf.mxu0 }
 0x19d   : > { %v1979_v27 = vpop.eup %1978  ;;  %v1490_v7 = vmul.f32 2.0, %v1704_v46  ;;  %v1269_v31 = vadd.f32 0.5, %v1195_v4  ;;  %v1196_v42 = vmul.f32 %v1109_v26, %v2740_v25  ;;  %v1111_v1 = vmul.f32 %v1977_v54, %v2827_v9  ;;  %v2896_v20 = vpop.f32.mrf.mxu1 }
 0x19e   : > { %v1981_v50 = vpop.eup %1980  ;;  %v1667_v55 = vclamps-f32 %v1231_v6, 1.0  ;;  %v1232_v61 = vadd.f32 0.5, %v1158_v32  ;;  %v1159_v14 = vmul.f32 %v1035_v51, %v2746_v48  ;;  %v1037_v23 = vmul.f32 %v1979_v27, %v2830_v38  ;;  %v2905_v51 = vpop.f32.mrf.mxu0 }
 0x19f   : > { %v1983_v0 = vpop.eup %1982  ;;  %1564 = vst [vmem:[%s2443_s9 + $0x1d0] sm:$0xff] %v1490_v7  ;;  %v1705_v60 = vclamps-f32 %v1269_v31, 1.0  ;;  %v1270_v52 = vadd.f32 0.5, %v1196_v42  ;;  %v1197_v5 = vmul.f32 %v1111_v1, %v2753_v45  ;;  %v1113_v25 = vmul.f32 %v1981_v50, %v2833_v36 }
 0x1a0   : > { %v1985_v59 = vpop.eup %1984  ;;  %v1453_v9 = vmul.f32 2.0, %v1667_v55  ;;  %v1668_v56 = vclamps-f32 %v1232_v61, 1.0  ;;  %v1233_v21 = vadd.f32 0.5, %v1159_v14  ;;  %v1160_v41 = vmul.f32 %v1037_v23, %v2757_v47 }
 0x1a1   : > { %v1987_v48 = vpop.eup %1986  ;;  %v1491_v38 = vmul.f32 2.0, %v1705_v60  ;;  %v1706_v57 = vclamps-f32 %v1270_v52, 1.0  ;;  %v1271_v30 = vadd.f32 0.5, %v1197_v5  ;;  %v1198_v63 = vmul.f32 %v1113_v25, %v2760_v58  ;;  %v421_v25 = vpop.f32.mrf.mxu0 }
 0x1a2   : > { %v1989_v45 = vpop.eup %1988  ;;  %1527 = vst [vmem:[%s2443_s9 + $0xa8] sm:$0xff] %v1453_v9  ;;  %v1454_v36 = vmul.f32 2.0, %v1668_v56  ;;  %v1669_v40 = vclamps-f32 %v1233_v21, 1.0  ;;  %v1234_v35 = vadd.f32 0.5, %v1160_v41  ;;  %v1039_v24 = vmul.f32 %v1983_v0, %v2836_v2 }
 0x1a3   : > { %1565 = vst [vmem:[%s2443_s9 + $0x1d8] sm:$0xff] %v1491_v38  ;;  %v1492_v47 = vmul.f32 2.0, %v1706_v57  ;;  %v1707_v46 = vclamps-f32 %v1271_v30, 1.0  ;;  %v1272_v4 = vadd.f32 0.5, %v1198_v63  ;;  %v1115_v26 = vmul.f32 %v1985_v59, %v2839_v44  ;;  %v529_v44 = vpop.f32.mrf.mxu1  ;;  %v425_v30 = vpop.f32.mrf.mxu0 }
 0x1a4   : > { %1528 = vst [vmem:[%s2443_s9 + $0xb0] sm:$0xff] %v1454_v36  ;;  %v1455_v54 = vmul.f32 2.0, %v1669_v40  ;;  %v1670_v58 = vclamps-f32 %v1234_v35, 1.0  ;;  %v1161_v6 = vmul.f32 %v1039_v24, %v2764_v53  ;;  %v1041_v32 = vmul.f32 %v1987_v48, %v2843_v34 }
 0x1a5   : > { %v1991_v27 = vpop.eup %1990  ;;  %1566 = vst [vmem:[%s2443_s9 + $0x1e0] sm:$0xff] %v1492_v47  ;;  %v1493_v2 = vmul.f32 2.0, %v1707_v46  ;;  %v1708_v7 = vclamps-f32 %v1272_v4, 1.0  ;;  %v1199_v31 = vmul.f32 %v1115_v26, %v2769_v18  ;;  %v1117_v42 = vmul.f32 %v1989_v45, %v2847_v37 }
 0x1a6   : > { %v1993_v1 = vpop.eup %1992  ;;  %1529 = vst [vmem:[%s2443_s9 + $0xb8] sm:$0xff] %v1455_v54  ;;  %v1456_v50 = vmul.f32 2.0, %v1670_v58  ;;  %v1235_v53 = vadd.f32 0.5, %v1161_v6  ;;  %v1162_v34 = vmul.f32 %v1041_v32, %v2773_v28  ;;  %v1043_v55 = vmul.f32 %v1991_v27, %v2853_v33  ;;  %v427_v6 = vpop.f32.mrf.mxu0 }
 0x1a7   : > { %v1995_v61 = vpop.eup %1994  ;;  %1567 = vst [vmem:[%s2443_s9 + $0x1e8] sm:$0xff] %v1493_v2  ;;  %v1494_v14 = vmul.f32 2.0, %v1708_v7  ;;  %v1273_v23 = vadd.f32 0.5, %v1199_v31  ;;  %v1200_v0 = vmul.f32 %v1117_v42, %v2778_v49  ;;  %v1119_v18 = vmul.f32 %v1993_v1, %v2856_v39  ;;  %v533_v49 = vpop.f32.mrf.mxu1 }
 0x1a8   : > { %1530 = vst [vmem:[%s2443_s9 + $0xc0] sm:$0xff] %v1456_v50  ;;  %v1671_v37 = vclamps-f32 %v1235_v53, 1.0  ;;  %v1236_v60 = vadd.f32 0.5, %v1162_v34  ;;  %v1163_v52 = vmul.f32 %v1043_v55, %v2782_v8  ;;  %v1045_v5 = vmul.f32 %v1995_v61, %v2859_v13  ;;  %v431_v61 = vpop.f32.mrf.mxu0 }
 0x1a9   : > { %1568 = vst [vmem:[%s2443_s9 + $0x1f0] sm:$0xff] %v1494_v14  ;;  %v1709_v28 = vclamps-f32 %v1273_v23, 1.0  ;;  %v1274_v33 = vadd.f32 0.5, %v1200_v0  ;;  %v1201_v59 = vmul.f32 %v1119_v18, %v2790_v43  ;;  %1996 = vrcp.f32 %v2879_v3  ;;  %v535_v36 = vpop.f32.mrf.mxu1 }
 0x1aa   : > { %v1457_v9 = vmul.f32 2.0, %v1671_v37  ;;  %v1672_v39 = vclamps-f32 %v1236_v60, 1.0  ;;  %v1237_v56 = vadd.f32 0.5, %v1163_v52  ;;  %v1164_v21 = vmul.f32 %v1045_v5, %v2797_v62 }
 0x1ab   : > { %v1495_v41 = vmul.f32 2.0, %v1709_v28  ;;  %v1710_v8 = vclamps-f32 %v1274_v33, 1.0  ;;  %v1275_v13 = vadd.f32 0.5, %v1201_v59  ;;  %v943_v48 = vadd.f32 2.0, %v2874_v17  ;;  %v539_v7 = vpop.f32.mrf.mxu1 }
 0x1ac   : > { %1531 = vst [vmem:[%s2443_s9 + $0xc8] sm:$0xff] %v1457_v9  ;;  %v1458_v38 = vmul.f32 2.0, %v1672_v39  ;;  %v1673_v57 = vclamps-f32 %v1237_v56, 1.0  ;;  %v1238_v43 = vadd.f32 0.5, %v1164_v21  ;;  %v2927_v3 = vadd.f32 %v2885_v15, %v2282_v12  ;;  %v433_v39 = vpop.f32.mrf.mxu0 }
 0x1ad   : > { %1569 = vst [vmem:[%s2443_s9 + $0x1f8] sm:$0xff] %v1495_v41  ;;  %v1496_v63 = vmul.f32 2.0, %v1710_v8  ;;  %v1711_v62 = vclamps-f32 %v1275_v13, 1.0  ;;  %1998 = vrcp.f32 %v943_v48  ;;  %v2932_v45 = vadd.f32 %v2881_v16, %v2280_v11  ;;  %v541_v18 = vpop.f32.mrf.mxu1 }
 0x1ae   : > { %1532 = vst [vmem:[%s2443_s9 + $0xd0] sm:$0xff] %v1458_v38  ;;  %v1459_v40 = vmul.f32 2.0, %v1673_v57  ;;  %v1674_v35 = vclamps-f32 %v1238_v43, 1.0  ;;  %v611_v24 = vmin.f32 %v2927_v3, 20.0  ;;  %v2938_v15 = vadd.f32 %v2896_v20, %v2280_v11 }
 0x1af   : > { %1570 = vst [vmem:[%s2443_s9 + $0x200] sm:$0xff] %v1496_v63  ;;  %v1497_v47 = vmul.f32 2.0, %v1711_v62  ;;  %v574_v46 = vmin.f32 %v2932_v45, 20.0  ;;  %v2944_v16 = vadd.f32 %v2893_v10, %v2282_v12  ;;  %v2947_v4 = vadd.f32 %v529_v44, %v2282_v12 }
 0x1b0   : > { %1533 = vst [vmem:[%s2443_s9 + $0xd8] sm:$0xff] %v1459_v40  ;;  %v1460_v26 = vmul.f32 2.0, %v1674_v35  ;;  %v752_v54 = vmul.f32 1.442695, %v611_v24  ;;  %v612_v58 = vmin.f32 %v2938_v15, 20.0  ;;  %v2953_v20 = vadd.f32 %v2905_v51, %v2280_v11 }
 0x1b1   : > { %1571 = vst [vmem:[%s2443_s9 + $0x208] sm:$0xff] %v1497_v47  ;;  %v678_v32 = vmul.f32 1.442695, %v574_v46  ;;  %v575_v27 = vmin.f32 %v2944_v16, 20.0  ;;  %v613_v10 = vmin.f32 %v2947_v4, 20.0  ;;  %v2959_v2 = vadd.f32 %v533_v49, %v2280_v11 }
 0x1b2   : > { %1534 = vst [vmem:[%s2443_s9 + $0xe0] sm:$0xff] %v1460_v26  ;;  %2000 = vpow2.f32 %v752_v54  ;;  %v754_v31 = vmul.f32 1.442695, %v612_v58  ;;  %v576_v42 = vmin.f32 %v2953_v20, 20.0  ;;  %v2964_v44 = vadd.f32 %v421_v25, %v2282_v12 }
 0x1b3   : > { %2002 = vpow2.f32 %v678_v32  ;;  %v680_v51 = vmul.f32 1.442695, %v575_v27  ;;  %v756_v1 = vmul.f32 1.442695, %v613_v10  ;;  %v614_v50 = vmin.f32 %v2959_v2, 20.0 }
 0x1b4   : > { %2004 = vpow2.f32 %v754_v31  ;;  %v682_v53 = vmul.f32 1.442695, %v576_v42  ;;  %v577_v34 = vmin.f32 %v2964_v44, 20.0  ;;  %v2969_v55 = vadd.f32 %v535_v36, %v2282_v12 }
 0x1b5   : > { %2006 = vpow2.f32 %v680_v51  ;;  %v758_v14 = vmul.f32 1.442695, %v614_v50  ;;  %v2972_v23 = vadd.f32 %v425_v30, %v2280_v11  ;;  %v2975_v0 = vadd.f32 %v539_v7, %v2280_v11 }
 0x1b6   : > { %v1997_v37 = vpop.eup %1996  ;;  %2008 = vpow2.f32 %v756_v1  ;;  %v684_v60 = vmul.f32 1.442695, %v577_v34  ;;  %v615_v52 = vmin.f32 %v2969_v55, 20.0  ;;  %v2979_v5 = vadd.f32 %v427_v6, %v2282_v12 }
 0x1b7   : > { %v1121_v25 = vmul.f32 %v1997_v37, %v2869_v29  ;;  %2010 = vpow2.f32 %v682_v53  ;;  %v578_v28 = vmin.f32 %v2972_v23, 20.0  ;;  %v616_v33 = vmin.f32 %v2975_v0, 20.0 }
 0x1b8   : > { %2012 = vpow2.f32 %v758_v14  ;;  %v760_v59 = vmul.f32 1.442695, %v615_v52  ;;  %v579_v49 = vmin.f32 %v2979_v5, 20.0  ;;  %v2986_v9 = vadd.f32 %v541_v18, %v2282_v12 }
 0x1b9   : > { %v1202_v56 = vmul.f32 %v1121_v25, %v2802_v19  ;;  %2014 = vpow2.f32 %v684_v60  ;;  %v686_v21 = vmul.f32 1.442695, %v578_v28  ;;  %v762_v41 = vmul.f32 1.442695, %v616_v33 }
 0x1ba   : > { %v1999_v8 = vpop.eup %1998  ;;  %2016 = vpow2.f32 %v760_v59  ;;  %v688_v29 = vmul.f32 1.442695, %v579_v49  ;;  %v617_v13 = vmin.f32 %v2986_v9, 20.0  ;;  %v2991_v48 = vadd.f32 %v431_v61, %v2280_v11 }
 0x1bb   : > { %v1276_v38 = vadd.f32 0.5, %v1202_v56  ;;  %v1047_v57 = vmul.f32 %v1999_v8, %v2874_v17  ;;  %2018 = vpow2.f32 %v686_v21  ;;  %v2995_v43 = vadd.f32 %v433_v39, %v2282_v12 }
 0x1bc   : > { %2020 = vpow2.f32 %v762_v41  ;;  %v764_v19 = vmul.f32 1.442695, %v617_v13  ;;  %v580_v30 = vmin.f32 %v2991_v48, 20.0 }
 0x1bd   : > { %v1712_v63 = vclamps-f32 %v1276_v38, 1.0  ;;  %v1165_v62 = vmul.f32 %v1047_v57, %v2807_v22  ;;  %2022 = vpow2.f32 %v688_v29  ;;  %v581_v36 = vmin.f32 %v2995_v43, 20.0 }
 0x1be   : > { %2024 = vpow2.f32 %v764_v19  ;;  %v690_v11 = vmul.f32 1.442695, %v580_v30 }
 0x1bf   : > { %v2001_v40 = vpop.eup %2000  ;;  %v1498_v35 = vmul.f32 2.0, %v1712_v63  ;;  %v1239_v17 = vadd.f32 0.5, %v1165_v62  ;;  %v692_v24 = vmul.f32 1.442695, %v581_v36 }
 0x1c0   : > { %v2003_v47 = vpop.eup %2002  ;;  %v833_v12 = vadd.f32 2.0, %v2001_v40  ;;  %2026 = vpow2.f32 %v690_v11 }
 0x1c1   : > { %v2005_v46 = vpop.eup %2004  ;;  %1572 = vst [vmem:[%s2443_s9 + $0x210] sm:$0xff] %v1498_v35  ;;  %v1675_v26 = vclamps-f32 %v1239_v17, 1.0  ;;  %v796_v54 = vadd.f32 2.0, %v2003_v47  ;;  %2028 = vpow2.f32 %v692_v24 }
 0x1c2   : > { %v2007_v58 = vpop.eup %2006  ;;  %v3001_v22 = vmul.f32 %v2001_v40, %v833_v12  ;;  %v834_v6 = vadd.f32 2.0, %v2005_v46 }
 0x1c3   : > { %v2009_v32 = vpop.eup %2008  ;;  %v1461_v27 = vmul.f32 2.0, %v1675_v26  ;;  %v3003_v10 = vmul.f32 %v2003_v47, %v796_v54  ;;  %v797_v7 = vadd.f32 2.0, %v2007_v58 }
 0x1c4   : > { %v2011_v31 = vpop.eup %2010  ;;  %v981_v42 = vadd.f32 2.0, %v3001_v22  ;;  %v3006_v51 = vmul.f32 %v2005_v46, %v834_v6  ;;  %v835_v1 = vadd.f32 2.0, %v2009_v32 }
 0x1c5   : > { %v2013_v50 = vpop.eup %2012  ;;  %1535 = vst [vmem:[%s2443_s9 + $0xe8] sm:$0xff] %v1461_v27  ;;  %v944_v53 = vadd.f32 2.0, %v3003_v10  ;;  %v3010_v34 = vmul.f32 %v2007_v58, %v797_v7  ;;  %v798_v61 = vadd.f32 2.0, %v2011_v31 }
 0x1c6   : > { %v2015_v14 = vpop.eup %2014  ;;  %2030 = vrcp.f32 %v981_v42  ;;  %v982_v18 = vadd.f32 2.0, %v3006_v51  ;;  %v3013_v37 = vmul.f32 %v2009_v32, %v835_v1  ;;  %v836_v60 = vadd.f32 2.0, %v2013_v50 }
 0x1c7   : > { %v2017_v52 = vpop.eup %2016  ;;  %2032 = vrcp.f32 %v944_v53  ;;  %v945_v25 = vadd.f32 2.0, %v3010_v34  ;;  %v3016_v28 = vmul.f32 %v2011_v31, %v798_v61  ;;  %v799_v33 = vadd.f32 2.0, %v2015_v14 }
 0x1c8   : > { %v2019_v59 = vpop.eup %2018  ;;  %2034 = vrcp.f32 %v982_v18  ;;  %v983_v49 = vadd.f32 2.0, %v3013_v37  ;;  %v3019_v39 = vmul.f32 %v2013_v50, %v836_v60  ;;  %v837_v56 = vadd.f32 2.0, %v2017_v52 }
 0x1c9   : > { %v2021_v21 = vpop.eup %2020  ;;  %2036 = vrcp.f32 %v945_v25  ;;  %v946_v41 = vadd.f32 2.0, %v3016_v28  ;;  %v3022_v8 = vmul.f32 %v2015_v14, %v799_v33  ;;  %v800_v29 = vadd.f32 2.0, %v2019_v59 }
 0x1ca   : > { %v2023_v13 = vpop.eup %2022  ;;  %2038 = vrcp.f32 %v983_v49  ;;  %v984_v38 = vadd.f32 2.0, %v3019_v39  ;;  %v3025_v57 = vmul.f32 %v2017_v52, %v837_v56  ;;  %v838_v19 = vadd.f32 2.0, %v2021_v21 }
 0x1cb   : > { %v2025_v30 = vpop.eup %2024  ;;  %2040 = vrcp.f32 %v946_v41  ;;  %v947_v63 = vadd.f32 2.0, %v3022_v8  ;;  %v3028_v62 = vmul.f32 %v2019_v59, %v800_v29  ;;  %v801_v36 = vadd.f32 2.0, %v2023_v13 }
 0x1cc   : > { %2042 = vrcp.f32 %v984_v38  ;;  %v985_v11 = vadd.f32 2.0, %v3025_v57  ;;  %v3031_v40 = vmul.f32 %v2021_v21, %v838_v19  ;;  %v839_v35 = vadd.f32 2.0, %v2025_v30 }
 0x1cd   : > { %v2027_v17 = vpop.eup %2026  ;;  %2044 = vrcp.f32 %v947_v63  ;;  %v948_v24 = vadd.f32 2.0, %v3028_v62  ;;  %v3034_v47 = vmul.f32 %v2023_v13, %v801_v36 }
 0x1ce   : > { %v2029_v12 = vpop.eup %2028  ;;  %2046 = vrcp.f32 %v985_v11  ;;  %v986_v46 = vadd.f32 2.0, %v3031_v40  ;;  %v3037_v26 = vmul.f32 %v2025_v30, %v839_v35  ;;  %v802_v54 = vadd.f32 2.0, %v2027_v17 }
 0x1cf   : > { %2048 = vrcp.f32 %v948_v24  ;;  %v949_v58 = vadd.f32 2.0, %v3034_v47  ;;  %v803_v6 = vadd.f32 2.0, %v2029_v12 }
 0x1d0   : > { %2050 = vrcp.f32 %v986_v46  ;;  %v987_v32 = vadd.f32 2.0, %v3037_v26  ;;  %v3041_v27 = vmul.f32 %v2027_v17, %v802_v54 }
 0x1d1   : > { %2052 = vrcp.f32 %v949_v58  ;;  %v3043_v7 = vmul.f32 %v2029_v12, %v803_v6 }
 0x1d2   : > { %2054 = vrcp.f32 %v987_v32  ;;  %v950_v31 = vadd.f32 2.0, %v3041_v27 }
 0x1d3   : > { %v2031_v42 = vpop.eup %2030  ;;  %v951_v1 = vadd.f32 2.0, %v3043_v7 }
 0x1d4   : > { %v2033_v50 = vpop.eup %2032  ;;  %v1123_v53 = vmul.f32 %v2031_v42, %v3001_v22  ;;  %2056 = vrcp.f32 %v950_v31 }
 0x1d5   : > { %v2035_v61 = vpop.eup %2034  ;;  %v1049_v14 = vmul.f32 %v2033_v50, %v3003_v10  ;;  %2058 = vrcp.f32 %v951_v1 }
 0x1d6   : > { %v2037_v18 = vpop.eup %2036  ;;  %v1203_v60 = vmul.f32 %v1123_v53, %v2927_v3  ;;  %v1125_v52 = vmul.f32 %v2035_v61, %v3006_v51 }
 0x1d7   : > { %v2039_v25 = vpop.eup %2038  ;;  %v1166_v33 = vmul.f32 %v1049_v14, %v2932_v45  ;;  %v1051_v59 = vmul.f32 %v2037_v18, %v3010_v34 }
 0x1d8   : > { %v2041_v49 = vpop.eup %2040  ;;  %v1277_v56 = vadd.f32 0.5, %v1203_v60  ;;  %v1204_v21 = vmul.f32 %v1125_v52, %v2938_v15  ;;  %v1127_v22 = vmul.f32 %v2039_v25, %v3013_v37 }
 0x1d9   : > { %v2043_v41 = vpop.eup %2042  ;;  %v1240_v29 = vadd.f32 0.5, %v1166_v33  ;;  %v1167_v10 = vmul.f32 %v1051_v59, %v2944_v16  ;;  %v1053_v13 = vmul.f32 %v2041_v49, %v3016_v28 }
 0x1da   : > { %v2045_v3 = vpop.eup %2044  ;;  %v1713_v38 = vclamps-f32 %v1277_v56, 1.0  ;;  %v1278_v51 = vadd.f32 0.5, %v1204_v21  ;;  %v1205_v19 = vmul.f32 %v1127_v22, %v2947_v4  ;;  %v1129_v45 = vmul.f32 %v2043_v41, %v3019_v39 }
 0x1db   : > { %v2047_v34 = vpop.eup %2046  ;;  %v1676_v30 = vclamps-f32 %v1240_v29, 1.0  ;;  %v1241_v63 = vadd.f32 0.5, %v1167_v10  ;;  %v1168_v15 = vmul.f32 %v1053_v13, %v2953_v20  ;;  %v1055_v37 = vmul.f32 %v2045_v3, %v3022_v8 }
 0x1dc   : > { %v2049_v36 = vpop.eup %2048  ;;  %v1499_v11 = vmul.f32 2.0, %v1713_v38  ;;  %v1714_v16 = vclamps-f32 %v1278_v51, 1.0  ;;  %v1279_v28 = vadd.f32 0.5, %v1205_v19  ;;  %v1206_v35 = vmul.f32 %v1129_v45, %v2959_v2 }
 0x1dd   : > { %v2051_v17 = vpop.eup %2050  ;;  %v1462_v24 = vmul.f32 2.0, %v1676_v30  ;;  %v1677_v4 = vclamps-f32 %v1241_v63, 1.0  ;;  %v1242_v39 = vadd.f32 0.5, %v1168_v15  ;;  %v1169_v12 = vmul.f32 %v1055_v37, %v2964_v44 }
 0x1de   : > { %v2053_v46 = vpop.eup %2052  ;;  %1573 = vst [vmem:[%s2443_s9 + $0x218] sm:$0xff] %v1499_v11  ;;  %v1500_v54 = vmul.f32 2.0, %v1714_v16  ;;  %v1715_v20 = vclamps-f32 %v1279_v28, 1.0  ;;  %v1280_v8 = vadd.f32 0.5, %v1206_v35  ;;  %v1131_v58 = vmul.f32 %v2047_v34, %v3025_v57 }
 0x1df   : > { %v2055_v6 = vpop.eup %2054  ;;  %1536 = vst [vmem:[%s2443_s9 + $0xf0] sm:$0xff] %v1462_v24  ;;  %v1463_v32 = vmul.f32 2.0, %v1677_v4  ;;  %v1678_v2 = vclamps-f32 %v1242_v39, 1.0  ;;  %v1243_v31 = vadd.f32 0.5, %v1169_v12  ;;  %v1057_v42 = vmul.f32 %v2049_v36, %v3028_v62 }
 0x1e0   : > { %1574 = vst [vmem:[%s2443_s9 + $0x220] sm:$0xff] %v1500_v54  ;;  %v1501_v1 = vmul.f32 2.0, %v1715_v20  ;;  %v1716_v44 = vclamps-f32 %v1280_v8, 1.0  ;;  %v1207_v50 = vmul.f32 %v1131_v58, %v2969_v55  ;;  %v1133_v53 = vmul.f32 %v2051_v17, %v3031_v40 }
 0x1e1   : > { %v2057_v61 = vpop.eup %2056  ;;  %1537 = vst [vmem:[%s2443_s9 + $0xf8] sm:$0xff] %v1463_v32  ;;  %v1464_v57 = vmul.f32 2.0, %v1678_v2  ;;  %v1679_v14 = vclamps-f32 %v1243_v31, 1.0  ;;  %v1170_v18 = vmul.f32 %v1057_v42, %v2972_v23  ;;  %v1059_v60 = vmul.f32 %v2053_v46, %v3034_v47 }
 0x1e2   : > { %v2059_v52 = vpop.eup %2058  ;;  %1575 = vst [vmem:[%s2443_s9 + $0x228] sm:$0xff] %v1501_v1  ;;  %v1502_v62 = vmul.f32 2.0, %v1716_v44  ;;  %v1281_v25 = vadd.f32 0.5, %v1207_v50  ;;  %v1208_v33 = vmul.f32 %v1133_v53, %v2975_v0  ;;  %v1135_v55 = vmul.f32 %v2055_v6, %v3037_v26 }
 0x1e3   : > { %1538 = vst [vmem:[%s2443_s9 + $0x100] sm:$0xff] %v1464_v57  ;;  %v1465_v40 = vmul.f32 2.0, %v1679_v14  ;;  %v1244_v59 = vadd.f32 0.5, %v1170_v18  ;;  %v1171_v49 = vmul.f32 %v1059_v60, %v2979_v5  ;;  %v1061_v56 = vmul.f32 %v2057_v61, %v3041_v27 }
 0x1e4   : > { %1576 = vst [vmem:[%s2443_s9 + $0x230] sm:$0xff] %v1502_v62  ;;  %v1717_v23 = vclamps-f32 %v1281_v25, 1.0  ;;  %v1282_v47 = vadd.f32 0.5, %v1208_v33  ;;  %v1209_v21 = vmul.f32 %v1135_v55, %v2986_v9  ;;  %v1063_v22 = vmul.f32 %v2059_v52, %v3043_v7 }
 0x1e5   : > { %1539 = vst [vmem:[%s2443_s9 + $0x108] sm:$0xff] %v1465_v40  ;;  %v1680_v0 = vclamps-f32 %v1244_v59, 1.0  ;;  %v1245_v41 = vadd.f32 0.5, %v1171_v49  ;;  %v1172_v26 = vmul.f32 %v1061_v56, %v2991_v48 }
 0x1e6   : > { %v1503_v29 = vmul.f32 2.0, %v1717_v23  ;;  %v1718_v10 = vclamps-f32 %v1282_v47, 1.0  ;;  %v1283_v5 = vadd.f32 0.5, %v1209_v21  ;;  %v1173_v27 = vmul.f32 %v1063_v22, %v2995_v43 }
 0x1e7   : > { %v1466_v13 = vmul.f32 2.0, %v1680_v0  ;;  %v1681_v3 = vclamps-f32 %v1245_v41, 1.0  ;;  %v1246_v9 = vadd.f32 0.5, %v1172_v26 }
 0x1e8   : > { %1577 = vst [vmem:[%s2443_s9 + $0x238] sm:$0xff] %v1503_v29  ;;  %v1504_v7 = vmul.f32 2.0, %v1718_v10  ;;  %v1719_v38 = vclamps-f32 %v1283_v5, 1.0  ;;  %v1247_v51 = vadd.f32 0.5, %v1173_v27 }
 0x1e9   : > { %1540 = vst [vmem:[%s2443_s9 + $0x110] sm:$0xff] %v1466_v13  ;;  %v1467_v19 = vmul.f32 2.0, %v1681_v3  ;;  %v1682_v45 = vclamps-f32 %v1246_v9, 1.0 }
 0x1ea   : > { %1578 = vst [vmem:[%s2443_s9 + $0x240] sm:$0xff] %v1504_v7  ;;  %v1505_v48 = vmul.f32 2.0, %v1719_v38  ;;  %v1683_v34 = vclamps-f32 %v1247_v51, 1.0 }
 0x1eb   : > { %1541 = vst [vmem:[%s2443_s9 + $0x118] sm:$0xff] %v1467_v19  ;;  %v1468_v30 = vmul.f32 2.0, %v1682_v45 }
 0x1ec   : > { %1579 = vst [vmem:[%s2443_s9 + $0x248] sm:$0xff] %v1505_v48  ;;  %v1469_v43 = vmul.f32 2.0, %v1683_v34 }
 0x1ed   : > { %1542 = vst [vmem:[%s2443_s9 + $0x120] sm:$0xff] %v1468_v30 }
 0x1ee   : > { %1543 = vst [vmem:[%s2443_s9 + $0x128] sm:$0xff] %v1469_v43 }
 0x1ef PF: > { %s13_s12 = sadd.s32 1, %s2066_s12  }
 0x1f0   : > { %p10_p4 = scmp.ge.s32.totalorder %s13_s12, 4  }
 0x1f2   :  { %12 = sbr.rel (!%p10_p4) target bundleno = 1 (0x1), region = 62 }

</bundles_post_ra>
